<compile_context>
chip_gen: v5e
topology: v5e:2x2
jax: 0.10.0
libtpu: 0.0.40
codegen_flags: <defaults>
</compile_context>

<pallas_src>
import functools

import jax
import jax.numpy as jnp
from jax.experimental import pallas as pl
from jax.experimental.pallas import tpu as pltpu

_LANES = 128
_SUBLANES = 8


def conv_bn_silu_kernel(x_ref, w_ref, bias_ref, o_ref, *, K, accumulate_taps):
    """One (batch n, row-tile h) grid step.

    x_ref:    (1, Hp, Wp, C1)       bf16  zero-padded image of batch n (constant over h)
    w_ref:    (K*K*C1, C2p)         bf16  im2col weights with the BN scale folded in
    bias_ref: (1, C2p)              f32   folded BatchNorm bias (zero in padded lanes)
    o_ref:    (1, TILE_H, Wt, C2p)  bf16  output row tile (lane-dense channels)
    """
    TILE_H, Wt, C2p = o_ref.shape[1], o_ref.shape[2], o_ref.shape[3]
    C1 = x_ref.shape[3]
    M = TILE_H * Wt

    # Row band for this output tile including the K-1 halo rows (H is a non-tiled
    # leading dim of the block, so this is a cheap offset load).
    h0 = pl.multiple_of(pl.program_id(1) * TILE_H, TILE_H)
    band = x_ref[0, pl.ds(h0, TILE_H + K - 1), :, :]            # (TILE_H+K-1, Wp, C1)

    # Pre-shift along W once per kw (K sublane shifts) and reuse across kh.
    shifted = [band[:, kw:kw + Wt, :] for kw in range(K)]        # (TILE_H+K-1, Wt, C1)

    if accumulate_taps:
        # Deep-C1 path: K*K accumulating dots. No K*K-duplicated im2col patch is
        # materialized in VMEM (saves vst bandwidth; on v7x the MRB accumulates
        # in place so the repeated accumulation is nearly free).
        acc = jnp.zeros((M, C2p), jnp.float32)
        for kh in range(K):
            for kw in range(K):
                tap = shifted[kw][kh:kh + TILE_H].reshape(M, C1)          # free merge
                wk = w_ref[pl.ds((kh * K + kw) * C1, C1), :]              # static slice
                acc = acc + jnp.dot(tap, wk, preferred_element_type=jnp.float32)
    else:
        # Shallow-C1 path: fold all K*K taps into ONE contraction of depth K*K*C1
        # so the MXU sees a deep enough contraction dimension.
        cols = []
        for kh in range(K):
            for kw in range(K):
                cols.append(shifted[kw][kh:kh + TILE_H].reshape(M, C1))
        patch = jnp.concatenate(cols, axis=1)                    # (M, K*K*C1) bf16
        acc = jnp.dot(patch, w_ref[...], preferred_element_type=jnp.float32)

    # Epilogue in f32: BN bias (scale already folded into the weights) + SiLU.
    # The SiLU divide goes through the EUP approx-reciprocal, off the VPU.
    y = acc + bias_ref[...]
    y = y * pl.reciprocal(1.0 + jnp.exp(-y), approx=True)
    o_ref[0, :, :, :] = y.reshape(TILE_H, Wt, C2p).astype(o_ref.dtype)


def _round_up(x, m):
    return -(-x // m) * m


def _pick_tile_h(N, H, Wt, C2p, out_itemsize):
    """Row-tile chooser: target MXU M = tile_h*Wt >= ~1024 when possible, keep the
    f32 accumulator + double-buffered output tile bounded, and keep >= 2 grid
    steps (dual-TC chips) when that does not shrink M below 512."""
    divisors = [d for d in range(1, H + 1) if H % d == 0]
    budget = 6 * 1024 * 1024

    def tile_bytes(th):
        m = th * Wt
        return m * C2p * 4 + 2 * m * C2p * out_itemsize

    fitting = [d for d in divisors if tile_bytes(d) <= budget] or [divisors[0]]
    tile_h = fitting[-1]                      # largest tile within budget
    for d in fitting:                         # smallest tile already reaching M>=1024
        if d * Wt >= 1024:
            tile_h = d
            break
    if N * (H // tile_h) < 2:                 # keep both TensorCores busy if cheap
        smaller = [d for d in fitting if d < tile_h and N * (H // d) >= 2]
        if smaller and smaller[-1] * Wt >= 512:
            tile_h = smaller[-1]
    return tile_h


def _vmem_limit_bytes():
    # Generation-aware scoped-VMEM limit: ~3/4 of physical, capped at 100 MiB
    # (v5e/v6e have 128 MiB per TC, v7x only 64 MiB).
    cap = 128 * 1024 * 1024
    try:
        cap = int(getattr(pltpu.get_tpu_info(), "vmem_capacity_bytes", cap))
    except Exception:
        pass
    return int(min(100 * 1024 * 1024, cap * 3 // 4))


def conv_bn_silu_nhwc(x_nhwc, w_oihw, gamma, beta, running_mean, running_var,
                      eps=1e-5, tile_h=None, out_dtype=jnp.bfloat16,
                      keep_padded_channels=False, accumulate_taps=None):
    """Hot path: NHWC in, NHWC out.  stride=1, dilation=1, groups=1, pad=k//2.

    Keep activations bf16 NHWC end-to-end and pass keep_padded_channels=True to
    chain layers without the post-call channel-slice HBM pass.
    """
    N, H, W, C1 = x_nhwc.shape
    C2, C1w, K, K2 = w_oihw.shape
    assert C1w == C1 and K == K2 and K % 2 == 1
    # TODO(synk): stride>1, dilation>1 and grouped/depthwise ultralytics Conv
    # variants are not handled by this stride-1 indexing scheme.
    p = K // 2

    C2p = _round_up(C2, _LANES)      # lane-dense output channels (unmasked stores)
    Wt = _round_up(W, _SUBLANES)     # sublane-aligned width: tap reshape stays free
    Hp, Wp = H + 2 * p, Wt + 2 * p

    out_itemsize = jnp.dtype(out_dtype).itemsize
    if tile_h is None:
        tile_h = _pick_tile_h(N, H, Wt, C2p, out_itemsize)
    assert H % tile_h == 0

    if accumulate_taps is None:
        accumulate_taps = C1 >= 128   # deep channels: skip the materialized patch

    # Zero SAME-padding (+ right pad to Wt) and bf16 for the MXU.
    # TODO(synk): fuse this pad/cast HBM pass into the kernel via a manual halo'd
    # row-band DMA (memory_space=pl.ANY); that also bounds input VMEM to ~2 row
    # bands for feature maps too large for v7x's 64 MiB VMEM.
    x_pad = jnp.pad(x_nhwc, ((0, 0), (p, p), (p, p + Wt - W), (0, 0))).astype(jnp.bfloat16)

    # Fold eval-mode BatchNorm: the per-output-channel scale goes into the weights
    # (mathematically exact); only the bias remains as an epilogue operand.
    # Padded weight columns / bias lanes are zero, so padded output channels are 0.
    scale = gamma / jnp.sqrt(running_var + eps)
    bias = beta - running_mean * scale
    w2 = jnp.transpose(w_oihw, (2, 3, 1, 0)).reshape(K * K * C1, C2) * scale[None, :]
    w2 = jnp.pad(w2, ((0, 0), (0, C2p - C2))).astype(jnp.bfloat16)
    bias_p = jnp.pad(bias, (0, C2p - C2)).reshape(1, C2p).astype(jnp.float32)

    cost = pl.CostEstimate(
        flops=2 * N * H * Wt * K * K * C1 * C2p,
        transcendentals=N * H * Wt * C2p,
        bytes_accessed=(N * Hp * Wp * C1 * 2          # bf16 input
                        + K * K * C1 * C2p * 2        # bf16 weights
                        + C2p * 4                     # bias
                        + N * H * Wt * C2p * out_itemsize),
    )

    out = pl.pallas_call(
        functools.partial(conv_bn_silu_kernel, K=K, accumulate_taps=accumulate_taps),
        out_shape=jax.ShapeDtypeStruct((N, H, Wt, C2p), out_dtype),
        grid_spec=pltpu.PrefetchScalarGridSpec(
            num_scalar_prefetch=0,
            grid=(N, H // tile_h),
            in_specs=[
                # Full padded image per batch element; block index is constant over
                # h so it is DMA'd once per n.  (See TODO above: for very large
                # feature maps this should become a halo'd manual-DMA row band.)
                pl.BlockSpec((1, Hp, Wp, C1), lambda n, h: (n, 0, 0, 0)),
                pl.BlockSpec((K * K * C1, C2p), lambda n, h: (0, 0)),
                pl.BlockSpec((1, C2p), lambda n, h: (0, 0)),
            ],
            out_specs=pl.BlockSpec((1, tile_h, Wt, C2p), lambda n, h: (n, h, 0, 0)),
        ),
        compiler_params=pltpu.CompilerParams(
            dimension_semantics=("parallel", "parallel"),
            vmem_limit_bytes=_vmem_limit_bytes(),
        ),
        cost_estimate=cost,
    )(x_pad, w2, bias_p)

    if Wt != W:
        out = out[:, :, :W, :]
    if not keep_padded_channels:
        out = out[..., :C2]          # extra HBM pass when C2 % 128 != 0; avoid in-model
    return out


def conv_bn_silu_nchw(x_nchw, w_oihw, gamma, beta, running_mean, running_var, eps=1e-5):
    """PyTorch-layout interface.  NOTE: the two transposes each cost a full HBM
    read+write; in a real model keep activations NHWC (bf16) end-to-end and call
    conv_bn_silu_nhwc directly."""
    x_nhwc = jnp.transpose(x_nchw, (0, 2, 3, 1))
    out_nhwc = conv_bn_silu_nhwc(x_nhwc, w_oihw, gamma, beta,
                                 running_mean, running_var, eps=eps)
    return jnp.transpose(out_nhwc, (0, 3, 1, 2))


if __name__ == "__main__":
    key = jax.random.PRNGKey(0)

    def run_case(case_key, N, C1, C2, H, W, K):
        kx, kwt, kg, kb, km, kv = jax.random.split(case_key, 6)
        x = jax.random.normal(kx, (N, C1, H, W), dtype=jnp.float32)
        w = jax.random.normal(kwt, (C2, C1, K, K), dtype=jnp.float32) * 0.1
        gamma = 1.0 + 0.1 * jax.random.normal(kg, (C2,), dtype=jnp.float32)
        beta = 0.1 * jax.random.normal(kb, (C2,), dtype=jnp.float32)
        rmean = 0.05 * jax.random.normal(km, (C2,), dtype=jnp.float32)
        rvar = 1.0 + 0.1 * jax.nn.softplus(jax.random.normal(kv, (C2,), dtype=jnp.float32))

        out = conv_bn_silu_nchw(x, w, gamma, beta, rmean, rvar)
        out = jax.block_until_ready(out).astype(jnp.float32)

        # Reference with the same bf16-input / scale-folded / f32-accumulate /
        # bf16-output math as the kernel.
        p = K // 2
        eps = 1e-5
        scale = gamma / jnp.sqrt(rvar + eps)
        bias = beta - rmean * scale
        xb = x.astype(jnp.bfloat16).astype(jnp.float32)
        wf = (w * scale[:, None, None, None]).astype(jnp.bfloat16).astype(jnp.float32)
        ref = jax.lax.conv_general_dilated(
            xb, wf, window_strides=(1, 1), padding=((p, p), (p, p)),
            dimension_numbers=("NCHW", "OIHW", "NCHW"))
        ref = ref + bias.reshape(1, C2, 1, 1)
        ref = ref * jax.nn.sigmoid(ref)
        ref = ref.astype(jnp.bfloat16).astype(jnp.float32)

        assert out.shape == (N, C2, H, W), out.shape
        max_err = float(jnp.max(jnp.abs(out - ref)))
        assert jnp.allclose(out, ref, rtol=1.5e-2, atol=1.5e-2), max_err

    k1, k2 = jax.random.split(key)
    run_case(k1, N=2, C1=4, C2=8, H=16, W=16, K=3)       # shallow-C1 (single im2col dot) path
    run_case(k2, N=1, C1=128, C2=128, H=16, W=16, K=3)   # deep-C1 (K*K accumulating dots) path
    print("KERNEL_OK")
</pallas_src>

<mosaic_0001>
module attributes {stable_mosaic.version = 11 : i64} {
  func.func @conv_bn_silu_kernel(%arg0: i32, %arg1: i32, %arg2: memref<1x18x18x4xbf16, #tpu.memory_space<vmem>>, %arg3: memref<36x128xbf16, #tpu.memory_space<vmem>>, %arg4: memref<1x128xf32, #tpu.memory_space<vmem>>, %arg5: memref<1x16x16x128xbf16, #tpu.memory_space<vmem>>) attributes {dimension_semantics = [#tpu.dimension_semantics<parallel>, #tpu.dimension_semantics<parallel>], iteration_bounds = array<i64: 2, 1>, scalar_prefetch = 0 : i64, scratch_operands = 0 : i64, tpu.core_type = #tpu.core_type<tc>, window_params = [{transform_indices = @transform_0, window_bounds = array<i64: 1, 18, 18, 4>}, {pipeline_mode = #tpu.pipeline_mode<synchronous>, transform_indices = @transform_1, window_bounds = array<i64: 36, 128>}, {pipeline_mode = #tpu.pipeline_mode<synchronous>, transform_indices = @transform_2, window_bounds = array<i64: 1, 128>}, {transform_indices = @transform_3, window_bounds = array<i64: 1, 16, 16, 128>}]} {
    %c16_i32 = arith.constant 16 : i32
    %0 = arith.muli %arg1, %c16_i32 : i32
    %1 = tpu.assume_multiple %0, 16 : i32
    %c0 = arith.constant 0 : index
    %2 = arith.index_cast %1 : i32 to index
    %c0_0 = arith.constant 0 : index
    %c0_1 = arith.constant 0 : index
    %3 = vector.load %arg2[%c0, %2, %c0_0, %c0_1] : memref<1x18x18x4xbf16, #tpu.memory_space<vmem>>, vector<1x18x18x4xbf16>
    %4 = vector.shape_cast %3 : vector<1x18x18x4xbf16> to vector<18x18x4xbf16>
    %5 = vector.extract_strided_slice %4 {offsets = [0, 0, 0], sizes = [18, 16, 4], strides = [1, 1, 1]} : vector<18x18x4xbf16> to vector<18x16x4xbf16>
    %6 = vector.extract_strided_slice %4 {offsets = [0, 1, 0], sizes = [18, 16, 4], strides = [1, 1, 1]} : vector<18x18x4xbf16> to vector<18x16x4xbf16>
    %7 = vector.extract_strided_slice %4 {offsets = [0, 2, 0], sizes = [18, 16, 4], strides = [1, 1, 1]} : vector<18x18x4xbf16> to vector<18x16x4xbf16>
    %8 = vector.extract_strided_slice %5 {offsets = [0, 0, 0], sizes = [16, 16, 4], strides = [1, 1, 1]} : vector<18x16x4xbf16> to vector<16x16x4xbf16>
    %9 = vector.shape_cast %8 : vector<16x16x4xbf16> to vector<256x4xbf16>
    %10 = vector.extract_strided_slice %6 {offsets = [0, 0, 0], sizes = [16, 16, 4], strides = [1, 1, 1]} : vector<18x16x4xbf16> to vector<16x16x4xbf16>
    %11 = vector.shape_cast %10 : vector<16x16x4xbf16> to vector<256x4xbf16>
    %12 = vector.extract_strided_slice %7 {offsets = [0, 0, 0], sizes = [16, 16, 4], strides = [1, 1, 1]} : vector<18x16x4xbf16> to vector<16x16x4xbf16>
    %13 = vector.shape_cast %12 : vector<16x16x4xbf16> to vector<256x4xbf16>
    %14 = vector.extract_strided_slice %5 {offsets = [1, 0, 0], sizes = [16, 16, 4], strides = [1, 1, 1]} : vector<18x16x4xbf16> to vector<16x16x4xbf16>
    %15 = vector.shape_cast %14 : vector<16x16x4xbf16> to vector<256x4xbf16>
    %16 = vector.extract_strided_slice %6 {offsets = [1, 0, 0], sizes = [16, 16, 4], strides = [1, 1, 1]} : vector<18x16x4xbf16> to vector<16x16x4xbf16>
    %17 = vector.shape_cast %16 : vector<16x16x4xbf16> to vector<256x4xbf16>
    %18 = vector.extract_strided_slice %7 {offsets = [1, 0, 0], sizes = [16, 16, 4], strides = [1, 1, 1]} : vector<18x16x4xbf16> to vector<16x16x4xbf16>
    %19 = vector.shape_cast %18 : vector<16x16x4xbf16> to vector<256x4xbf16>
    %20 = vector.extract_strided_slice %5 {offsets = [2, 0, 0], sizes = [16, 16, 4], strides = [1, 1, 1]} : vector<18x16x4xbf16> to vector<16x16x4xbf16>
    %21 = vector.shape_cast %20 : vector<16x16x4xbf16> to vector<256x4xbf16>
    %22 = vector.extract_strided_slice %6 {offsets = [2, 0, 0], sizes = [16, 16, 4], strides = [1, 1, 1]} : vector<18x16x4xbf16> to vector<16x16x4xbf16>
    %23 = vector.shape_cast %22 : vector<16x16x4xbf16> to vector<256x4xbf16>
    %24 = vector.extract_strided_slice %7 {offsets = [2, 0, 0], sizes = [16, 16, 4], strides = [1, 1, 1]} : vector<18x16x4xbf16> to vector<16x16x4xbf16>
    %25 = vector.shape_cast %24 : vector<16x16x4xbf16> to vector<256x4xbf16>
    %26 = tpu.concatenate %9, %11, %13, %15, %17, %19, %21, %23, %25 in 1 : vector<256x4xbf16>, vector<256x4xbf16>, vector<256x4xbf16>, vector<256x4xbf16>, vector<256x4xbf16>, vector<256x4xbf16>, vector<256x4xbf16>, vector<256x4xbf16>, vector<256x4xbf16> -> vector<256x36xbf16>
    %c0_2 = arith.constant 0 : index
    %c0_3 = arith.constant 0 : index
    %27 = vector.load %arg3[%c0_2, %c0_3] : memref<36x128xbf16, #tpu.memory_space<vmem>>, vector<36x128xbf16>
    %cst = arith.constant dense<0.000000e+00> : vector<256x128xf32>
    %28 = tpu.matmul %26, %27, %cst {dimension_numbers = #tpu.dot_dimension_numbers<[1], [0], [0], [1], [0, 0, 1, 1], [], []>} : vector<256x36xbf16>, vector<36x128xbf16>, vector<256x128xf32> -> vector<256x128xf32>
    %c0_4 = arith.constant 0 : index
    %c0_5 = arith.constant 0 : index
    %29 = vector.load %arg4[%c0_4, %c0_5] : memref<1x128xf32, #tpu.memory_space<vmem>>, vector<1x128xf32>
    %30 = vector.broadcast %29 : vector<1x128xf32> to vector<256x128xf32>
    %31 = arith.addf %28, %30 : vector<256x128xf32>
    %cst_6 = arith.constant 0.000000e+00 : f32
    %32 = vector.broadcast %cst_6 : f32 to vector<256x128xf32>
    %33 = arith.subf %32, %31 : vector<256x128xf32>
    %34 = math.exp %33 : vector<256x128xf32>
    %cst_7 = arith.constant 1.000000e+00 : f32
    %35 = vector.broadcast %cst_7 : f32 to vector<256x128xf32>
    %36 = arith.addf %35, %34 : vector<256x128xf32>
    %37 = tpu.reciprocal %36 {approx = true} : vector<256x128xf32> -> vector<256x128xf32>
    %38 = arith.mulf %31, %37 : vector<256x128xf32>
    %39 = vector.shape_cast %38 : vector<256x128xf32> to vector<16x16x128xf32>
    %40 = arith.truncf %39 : vector<16x16x128xf32> to vector<16x16x128xbf16>
    %c0_8 = arith.constant 0 : index
    %c0_9 = arith.constant 0 : index
    %c0_10 = arith.constant 0 : index
    %c0_11 = arith.constant 0 : index
    %41 = vector.load %arg5[%c0_8, %c0_9, %c0_10, %c0_11] : memref<1x16x16x128xbf16, #tpu.memory_space<vmem>>, vector<1x16x16x128xbf16>
    %42 = vector.shape_cast %41 : vector<1x16x16x128xbf16> to vector<16x16x128xbf16>
    %43 = vector.shape_cast %40 : vector<16x16x128xbf16> to vector<1x16x16x128xbf16>
    tpu.vector_store %arg5[%c0_8, %c0_9, %c0_10, %c0_11], %43 {strides = array<i32>} : memref<1x16x16x128xbf16, #tpu.memory_space<vmem>>, vector<1x16x16x128xbf16>,
    return
  }
  func.func @transform_0(%arg0: i32, %arg1: i32) -> (i32, i32, i32, i32) {
    %c0_i32 = arith.constant 0 : i32
    %c0_i32_0 = arith.constant 0 : i32
    %c0_i32_1 = arith.constant 0 : i32
    %c0_i32_2 = arith.constant 0 : i32
    return %arg0, %c0_i32, %c0_i32_0, %c0_i32_1 : i32, i32, i32, i32
  }
  func.func @transform_1(%arg0: i32, %arg1: i32) -> (i32, i32) {
    %c0_i32 = arith.constant 0 : i32
    %c0_i32_0 = arith.constant 0 : i32
    %c0_i32_1 = arith.constant 0 : i32
    return %c0_i32, %c0_i32_0 : i32, i32
  }
  func.func @transform_2(%arg0: i32, %arg1: i32) -> (i32, i32) {
    %c0_i32 = arith.constant 0 : i32
    %c0_i32_0 = arith.constant 0 : i32
    %c0_i32_1 = arith.constant 0 : i32
    return %c0_i32, %c0_i32_0 : i32, i32
  }
  func.func @transform_3(%arg0: i32, %arg1: i32) -> (i32, i32, i32, i32) {
    %c0_i32 = arith.constant 0 : i32
    %c0_i32_0 = arith.constant 0 : i32
    %c0_i32_1 = arith.constant 0 : i32
    return %arg0, %arg1, %c0_i32, %c0_i32_0 : i32, i32, i32, i32
  }
}

</mosaic_0001>

<bundles_post_ra>
// kernel: tpu_custom_call.1
= control target key start
LH: loop header
LB: loop body
LE: loop exit
PB: predicated region body
PF: predicated region fallthrough
CT: control target
= control target key end

     0   :  { %8 = vsyncpa [#allocation3], 0  ;;  %s3887_s0 = inlined_call_operand.vmem [shape: bf16[2,18,18,4], index: 0, kind: input, shape index: {}]   ;;  %s3888_s1 = inlined_call_operand.vmem [shape: bf16[36,128], index: 1, kind: input, shape index: {}]   ;;  %s3889_s2 = inlined_call_operand.vmem [shape: f32[1,128], index: 2, kind: input, shape index: {}]   ;;  %s3890_s3 = inlined_call_operand.hbm [shape: bf16[2,16,16,128], index: 3, kind: output, shape index: {}]  }
   0x1   :  { %10 = vsyncpa [#allocation3 + $0x1], 0  ;;  %s2613_s12 = smov 0   ;;  %s2615_s13 = smov 0  }
   0x2   :  { %s2617_s14 = smov 0   ;;  %s2619_s15 = smov 0  }
   0x3   :  { %s2621_s16 = smov 0   ;;  %s2623_s17 = smov 0  }
   0x4 LB: > { %s2059_s18 = sadd.s32 4294967295, %s2582_s17   ;;  %s2060_s19 = sadd.s32 4294967294, %s2582_s17   ;;  %s2582_s17 = sphi %s2623_s17, %s16_s17   ;;  %s2578_s16 = sphi %s2621_s16, %s3964_s16   ;;  %s2574_s15 = sphi %s2619_s15, %s3963_s15   ;;  %s2570_s14 = sphi %s2617_s14, %s3962_s14   ;;  %s2566_s13 = sphi %s2615_s13, %s3961_s13   ;;  %s2562_s12 = sphi %s2613_s12, %s3960_s12  }
   0x5   : > { %s28_s20 = sadd.s32 1, %s2578_s16  ;;  %s105_s21 = sadd.s32 1, %s2570_s14 }
   0x6   : > { %p30_p0 = scmp.ge.s32.totalorder %s28_s20, 2  ;;  %p115_p1 = scmp.ne.s32.totalorder %s2570_s14, %s2566_s13 }
   0x7   : > { %p116_p2 = scmp.eq.s32.totalorder %s2059_s18, 1  ;;  %p121_p3 = scmp.ne.s32.totalorder %s2566_s13, %s2562_s12 }
   0x8   : > { %s3966_s20 = smov (%p30_p0, %s28_s20), 0  ;;  %p122_p5 = scmp.eq.s32.totalorder %s2060_s19, 1 }
   0x9   : > { %p2653_p4 = por %p116_p2, %p115_p1  ;;  %s100_s23 = ssub.s32 %s2578_s16, %s3966_s20 }
   0xa   : > { %p2063_p6 = scmp.ge.s32.totalorder %s2582_s17, 1  ;;  %p103_p7 = scmp.eq.s32.totalorder %s100_s23, 0 }
   0xb   : > { %p2660_p8 = por %p122_p5, %p121_p3  ;;  %p154_p9 = scmp.lt.s32.totalorder %s2582_s17, 3 }
   0xc   : > { %s2666_s25 = scalar_select %p103_p7, %s2570_s14, %s105_s21  }
   0xd   : > { %p155_p10 = pnand %p2063_p6, %p154_p9 }
   0xf   : > { %158 = sbr.rel (%p155_p10) target bundleno = 693 (0x2b5), region = 32 }
  0x14   : > { %p178_p11 = scmp.lt.s32.totalorder %s2574_s15, 1  ;;  %vm243_vm0 = vsmask.f32 3328  ;;  %vm244_vm1 = vsmask.f32 7440  ;;  %s2584_s4 = smov 4  }
  0x15   : > { %vm2711_vm2 = vmor %vm243_vm0, %vm244_vm1  ;;  %vm678_vm3 = vcmask 1042432   ;;  %vm679_vm4 = vcmask 1046532   ;;  %s2585_s5 = smov 8   ;;  %s2586_s6 = smov 12   ;;  %vm1279_vm6 = vcmask 31744   ;;  %vm1328_vm7 = vcmask 64512  }
  0x16   : > { %s179_s26 = scalar_select %p178_p11, %s2574_s15, 1  ;;  %vm2998_vm5 = vmor %vm678_vm3, %vm679_vm4  ;;  %vm1361_vm8 = vcmask 97280   ;;  %vm1616_vm9 = vcmask 1041408   ;;  %vm1394_vm10 = vcmask 130048   ;;  %vm1427_vm11 = vcmask 162816  }
  0x17   : > { %s2587_s7 = smov 16   ;;  %s2588_s8 = smov 24   ;;  %vm1493_vm12 = vcmask 228352   ;;  %vm1460_vm13 = vcmask 195584   ;;  %vm1526_vm14 = vcmask 261120   ;;  %vm1583_vm15 = vcmask 293888  }
  0x18   : > { %s2310_s27 = smul.u32 216, %s179_s26  ;;  %s2589_s9 = smov 20  }
  0x19   : > { %s2590_s10 = smov 28   ;;  %s2591_s11 = smov 32  }
  0x1a   : > { %s2673_s30 = scalar_lea.vmem %s3887_s0, %s2310_s27  ;;  %s2524_s27 = scalar_lea.hbm %s3890_s3, 256 }
  0x1b   : > { %v2676_v0 = vld [vmem:[%s2673_s30 + $0x30] sm:$0xf]  ;;  %v2679_v1 = vld [vmem:[%s2673_s30 + $0x34] sm:$0xf]  ;;  %v2682_v2 = vld [vmem:[%s2673_s30 + $0x38] sm:$0x1] }
  0x1c   : > { %v343_v3 = vshrl.u32 %v2676_v0, 16  ;;  %v346_v4 = vshll.u32 %v2676_v0, 16  ;;  %v352_v5 = vshll.u32 %v2679_v1, 16  ;;  %v356_v6 = vshrl.u32 %v2679_v1, 16  ;;  %v2689_v7 = vld [vmem:[%s2673_s30 + $0x18] sm:$0xf] }
  0x1d   : > { %v362_v8 = vshll.u32 %v2682_v2, 16  ;;  %v2693_v9 = vld [vmem:[%s2673_s30 + $0x1c] sm:$0xf]  ;;  %v2696_v10 = vld [vmem:[%s2673_s30 + $0x20] sm:$0x1]  ;;  %v295_v11 = vshrl.u32 %v2689_v7, 16 }
  0x1e   : > { %v345_v12 = vrot.slane %v343_v3, 4  ;;  %v348_v13 = vrot.slane %v346_v4, 5  ;;  %v354_v14 = vrot.slane %v352_v5, 5  ;;  %v358_v15 = vrot.slane %v356_v6, 4  ;;  %v2700_v16 = vld [vmem:[%s2673_s30] sm:$0xf] }
  0x1f   : > { %v364_v17 = vrot.slane %v362_v8, 5  ;;  %v297_v18 = vrot.slane %v295_v11, 4  ;;  %v298_v19 = vshll.u32 %v2689_v7, 16  ;;  %v304_v20 = vshll.u32 %v2693_v9, 16  ;;  %v2707_v25 = vld [vmem:[%s2673_s30 + $0x4] sm:$0xf] }
  0x20   : > { %v349_v21 = vor.u32 %v348_v13, %v345_v12  ;;  %v359_v22 = vor.u32 %v358_v15, %v354_v14  ;;  %v308_v23 = vshrl.u32 %v2693_v9, 16  ;;  %v314_v24 = vshll.u32 %v2696_v10, 16  ;;  %v2718_v36 = vld [vmem:[%s2673_s30 + $0x8] sm:$0x1]  ;;  %v2727_v44 = vld [vmem:[%s2673_s30 + $0x3c] sm:$0xf] }
  0x21   : > { %v300_v27 = vrot.slane %v298_v19, 5  ;;  %v306_v28 = vrot.slane %v304_v20, 5  ;;  %v247_v29 = vshrl.u32 %v2700_v16, 16  ;;  %v250_v30 = vshll.u32 %v2700_v16, 16  ;;  %v2735_v56 = vld [vmem:[%s2673_s30 + $0x40] sm:$0xf] }
  0x22   : > { %v350_v31 = vrot.slane %v349_v21, 4  ;;  %v360_v32 = vrot.slane %v359_v22, 4  ;;  %v310_v33 = vrot.slane %v308_v23, 4  ;;  %v316_v34 = vrot.slane %v314_v24, 5  ;;  %v2741_v62 = vld [vmem:[%s2673_s30 + $0x44] sm:$0x1] }
  0x23   : > { %v301_v35 = vor.u32 %v300_v27, %v297_v18  ;;  %v249_v37 = vrot.slane %v247_v29, 4  ;;  %v252_v38 = vrot.slane %v250_v30, 5  ;;  %v256_v39 = vshll.u32 %v2707_v25, 16  ;;  %v2744_v63 = vld [vmem:[%s2673_s30 + $0x24] sm:$0xf] }
  0x24   : > { %v355_v40 = vsel %vm2711_vm2, %v350_v31, %v354_v14  ;;  %v365_v41 = vsel %vm2711_vm2, %v360_v32, %v364_v17  ;;  %v311_v42 = vor.u32 %v310_v33, %v306_v28  ;;  %v260_v43 = vshrl.u32 %v2707_v25, 16  ;;  %v2754_v14 = vld [vmem:[%s2673_s30 + $0x28] sm:$0xf]  ;;  %v2760_v19 = vld [vmem:[%s2673_s30 + $0x2c] sm:$0x1] }
  0x25   : > { %v917_v45 = vunpack.c.l.b16 %v355_v40  ;;  %v918_v46 = vunpack.c.l.b16 %v365_v41  ;;  %v302_v47 = vrot.slane %v301_v35, 4  ;;  %v253_v48 = vor.u32 %v252_v38, %v249_v37  ;;  %v2767_v27 = vld [vmem:[%s2673_s30 + $0xc] sm:$0xf]  ;;  %v2775_v40 = vld [vmem:[%s2673_s30 + $0x10] sm:$0xf] }
  0x26   : > { %v312_v49 = vrot.slane %v311_v42, 4  ;;  %v258_v50 = vrot.slane %v256_v39, 5  ;;  %v262_v51 = vrot.slane %v260_v43, 4  ;;  %v266_v52 = vshll.u32 %v2718_v36, 16 }
  0x27   : > { %v2730_v53 = vpack.c.b16 %v918_v46, %v917_v45  ;;  %v307_v54 = vsel %vm2711_vm2, %v302_v47, %v306_v28  ;;  %v254_v55 = vrot.slane %v253_v48, 4  ;;  %v367_v57 = vshrl.u32 %v2727_v44, 16  ;;  %v2779_v47 = vld [vmem:[%s2673_s30 + $0x14] sm:$0x1] }
  0x28   : > { %v317_v58 = vsel %vm2711_vm2, %v312_v49, %v316_v34  ;;  %v913_v59 = vunpack.c.l.b16 %v307_v54  ;;  %v263_v60 = vor.u32 %v262_v51, %v258_v50  ;;  %v268_v61 = vrot.slane %v266_v52, 5  ;;  %v2786_v52 = vld [vmem:[%s2673_s30 + $0x60] sm:$0xf] }
  0x29   : > { %3920 = vst [vmem:[#allocation5_spill] sm:$0xff] %v2730_v53  ;;  %965 = vrot.lane.b32.xlu2 %v2730_v53, %s2584_s4  ;;  %v914_v3 = vunpack.c.l.b16 %v317_v58  ;;  %v259_v4 = vsel %vm2711_vm2, %v254_v55, %v258_v50  ;;  %v369_v5 = vrot.slane %v367_v57, 4  ;;  %v370_v6 = vshll.u32 %v2727_v44, 16 }
  0x2a   : > { %v264_v8 = vrot.slane %v263_v60, 4  ;;  %v909_v11 = vunpack.c.l.b16 %v259_v4  ;;  %v376_v12 = vshll.u32 %v2735_v56, 16  ;;  %v380_v13 = vshrl.u32 %v2735_v56, 16 }
  0x2b   : > { %v2756_v15 = vpack.c.b16 %v914_v3, %v913_v59  ;;  %v372_v17 = vrot.slane %v370_v6, 5  ;;  %v386_v18 = vshll.u32 %v2741_v62, 16  ;;  %v319_v20 = vshrl.u32 %v2744_v63, 16 }
  0x2c   : > { %v269_v21 = vsel %vm2711_vm2, %v264_v8, %v268_v61  ;;  %v378_v22 = vrot.slane %v376_v12, 5  ;;  %v382_v23 = vrot.slane %v380_v13, 4  ;;  %v322_v24 = vshll.u32 %v2744_v63, 16  ;;  %v2796_v8 = vld [vmem:[%s2673_s30 + $0x64] sm:$0xf] }
  0x2d   : > { %3921 = vst [vmem:[#allocation6_spill] sm:$0xff] %v2756_v15  ;;  %961 = vrot.lane.b32.xlu1 %v2756_v15, %s2584_s4  ;;  %v910_v28 = vunpack.c.l.b16 %v269_v21  ;;  %v373_v29 = vor.u32 %v372_v17, %v369_v5  ;;  %v388_v30 = vrot.slane %v386_v18, 5  ;;  %v321_v31 = vrot.slane %v319_v20, 4  ;;  %v2802_v20 = vld [vmem:[%s2673_s30 + $0x68] sm:$0x1] }
  0x2e   : > { %v383_v32 = vor.u32 %v382_v23, %v378_v22  ;;  %v324_v33 = vrot.slane %v322_v24, 5  ;;  %v328_v34 = vshll.u32 %v2754_v14, 16  ;;  %v332_v35 = vshrl.u32 %v2754_v14, 16  ;;  %v2805_v21 = vld [vmem:[%s2673_s30 + $0x54] sm:$0xf] }
  0x2f   : > { %v941_v37 = vpack.c.b16 %v910_v28, %v909_v11  ;;  %v374_v38 = vrot.slane %v373_v29, 4  ;;  %v338_v39 = vshll.u32 %v2760_v19, 16  ;;  %v271_v41 = vshrl.u32 %v2767_v27, 16 }
  0x30   : > { %v384_v42 = vrot.slane %v383_v32, 4  ;;  %v325_v43 = vor.u32 %v324_v33, %v321_v31  ;;  %v330_v45 = vrot.slane %v328_v34, 5  ;;  %v334_v46 = vrot.slane %v332_v35, 4 }
  0x31   : > { %957 = vrot.lane.b32.xlu0 %v941_v37, %s2584_s4  ;;  %v379_v48 = vsel %vm2711_vm2, %v374_v38, %v378_v22  ;;  %v340_v49 = vrot.slane %v338_v39, 5  ;;  %v273_v50 = vrot.slane %v271_v41, 4  ;;  %v274_v51 = vshll.u32 %v2767_v27, 16  ;;  %v2816_v37 = vld [vmem:[%s2673_s30 + $0x58] sm:$0xf] }
  0x32   : > { %v389_v54 = vsel %vm2711_vm2, %v384_v42, %v388_v30  ;;  %v919_v55 = vunpack.c.l.b16 %v379_v48  ;;  %v326_v57 = vrot.slane %v325_v43, 4  ;;  %v335_v58 = vor.u32 %v334_v46, %v330_v45 }
  0x33   : > { %v920_v59 = vunpack.c.l.b16 %v389_v54  ;;  %v276_v60 = vrot.slane %v274_v51, 5  ;;  %v280_v61 = vshll.u32 %v2775_v40, 16  ;;  %v284_v3 = vshrl.u32 %v2775_v40, 16 }
  0x34   : > { %v331_v4 = vsel %vm2711_vm2, %v326_v57, %v330_v45  ;;  %v336_v5 = vrot.slane %v335_v58, 4  ;;  %v290_v6 = vshll.u32 %v2779_v47, 16  ;;  %v439_v11 = vshrl.u32 %v2786_v52, 16  ;;  %v2824_v45 = vld [vmem:[%s2673_s30 + $0x5c] sm:$0x1] }
  0x35   : > { %v2799_v12 = vpack.c.b16 %v920_v59, %v919_v55  ;;  %v915_v13 = vunpack.c.l.b16 %v331_v4  ;;  %v277_v17 = vor.u32 %v276_v60, %v273_v50  ;;  %v282_v18 = vrot.slane %v280_v61, 5  ;;  %v2831_v58 = vld [vmem:[%s2673_s30 + $0x48] sm:$0xf] }
  0x36   : > { %v341_v22 = vsel %vm2711_vm2, %v336_v5, %v340_v49  ;;  %v286_v23 = vrot.slane %v284_v3, 4  ;;  %v292_v24 = vrot.slane %v290_v6, 5  ;;  %v441_v28 = vrot.slane %v439_v11, 4 }
  0x37   : > { %3922 = vst [vmem:[#allocation7_spill] sm:$0xff] %v2799_v12  ;;  %967 = vrot.lane.b32.xlu2 %v2799_v12, %s2584_s4  ;;  %v916_v29 = vunpack.c.l.b16 %v341_v22  ;;  %v278_v30 = vrot.slane %v277_v17, 4  ;;  %v442_v31 = vshll.u32 %v2786_v52, 16  ;;  %v448_v32 = vshll.u32 %v2796_v8, 16  ;;  %v2838_v22 = vld [vmem:[%s2673_s30 + $0x4c] sm:$0xf] }
  0x38   : > { %v287_v33 = vor.u32 %v286_v23, %v282_v18  ;;  %v452_v34 = vshrl.u32 %v2796_v8, 16  ;;  %v458_v35 = vshll.u32 %v2802_v20, 16  ;;  %v415_v38 = vshrl.u32 %v2805_v21, 16  ;;  %v2950_v12 = vld [vmem:[%s2673_s30 + $0xa0] sm:$0xf] }
  0x39   : > { %v2819_v39 = vpack.c.b16 %v916_v29, %v915_v13  ;;  %v283_v41 = vsel %vm2711_vm2, %v278_v30, %v282_v18  ;;  %v444_v42 = vrot.slane %v442_v31, 5  ;;  %v450_v43 = vrot.slane %v448_v32, 5  ;;  %v2846_v30 = vld [vmem:[%s2673_s30 + $0x50] sm:$0x1]  ;;  %v2850_v32 = vld [vmem:[%s2673_s30 + $0x84] sm:$0xf] }
  0x3a   : > { %v288_v46 = vrot.slane %v287_v33, 4  ;;  %v911_v48 = vunpack.c.l.b16 %v283_v41  ;;  %v454_v49 = vrot.slane %v452_v34, 4  ;;  %v460_v50 = vrot.slane %v458_v35, 5 }
  0x3b   : > { %3923 = vst [vmem:[#allocation8_spill] sm:$0xff] %v2819_v39  ;;  %963 = vrot.lane.b32.xlu1 %v2819_v39, %s2584_s4  ;;  %v445_v51 = vor.u32 %v444_v42, %v441_v28  ;;  %v417_v54 = vrot.slane %v415_v38, 4  ;;  %v418_v55 = vshll.u32 %v2805_v21, 16  ;;  %v424_v57 = vshll.u32 %v2816_v37, 16 }
  0x3c   : > { %v293_v59 = vsel %vm2711_vm2, %v288_v46, %v292_v24  ;;  %v455_v60 = vor.u32 %v454_v49, %v450_v43  ;;  %v428_v61 = vshrl.u32 %v2816_v37, 16  ;;  %v434_v3 = vshll.u32 %v2824_v45, 16 }
  0x3d   : > { %v912_v4 = vunpack.c.l.b16 %v293_v59  ;;  %v446_v5 = vrot.slane %v445_v51, 4  ;;  %v420_v6 = vrot.slane %v418_v55, 5  ;;  %v426_v11 = vrot.slane %v424_v57, 5 }
  0x3e   : > { %v456_v13 = vrot.slane %v455_v60, 4  ;;  %v430_v17 = vrot.slane %v428_v61, 4  ;;  %v436_v18 = vrot.slane %v434_v3, 5  ;;  %v391_v23 = vshrl.u32 %v2831_v58, 16  ;;  %v2865_v60 = vld [vmem:[%s2673_s30 + $0x88] sm:$0xf] }
  0x3f   : > { %v2841_v28 = vpack.c.b16 %v912_v4, %v911_v48  ;;  %v451_v24 = vsel %vm2711_vm2, %v446_v5, %v450_v43  ;;  %v421_v29 = vor.u32 %v420_v6, %v417_v54  ;;  %v394_v31 = vshll.u32 %v2831_v58, 16  ;;  %v2868_v61 = vld [vmem:[%s2673_s30 + $0x8c] sm:$0x1] }
  0x40   : > { %v461_v33 = vsel %vm2711_vm2, %v456_v13, %v460_v50  ;;  %v925_v34 = vunpack.c.l.b16 %v451_v24  ;;  %v431_v35 = vor.u32 %v430_v17, %v426_v11  ;;  %v393_v38 = vrot.slane %v391_v23, 4  ;;  %3926 = vst [vmem:[#allocation11_spill] sm:$0xff] %v2868_v61  ;;  %v2873_v13 = vld [vmem:[%s2673_s30 + $0x78] sm:$0xf] }
  0x41   : > { %3924 = vst [vmem:[#allocation9_spill] sm:$0xff] %v2841_v28  ;;  %959 = vrot.lane.b32.xlu0 %v2841_v28, %s2584_s4  ;;  %v926_v41 = vunpack.c.l.b16 %v461_v33  ;;  %v422_v42 = vrot.slane %v421_v29, 4  ;;  %v396_v43 = vrot.slane %v394_v31, 5  ;;  %v400_v46 = vshll.u32 %v2838_v22, 16  ;;  %v2958_v28 = vld [vmem:[%s2673_s30 + $0xa4] sm:$0x1] }
  0x42   : > { %v432_v48 = vrot.slane %v431_v35, 4  ;;  %v404_v49 = vshrl.u32 %v2838_v22, 16  ;;  %v410_v51 = vshll.u32 %v2846_v30, 16  ;;  %v511_v50 = vshrl.u32 %v2850_v32, 16 }
  0x43   : > { %v2860_v54 = vpack.c.b16 %v926_v41, %v925_v34  ;;  %v427_v55 = vsel %vm2711_vm2, %v422_v42, %v426_v11  ;;  %v397_v57 = vor.u32 %v396_v43, %v393_v38  ;;  %v402_v59 = vrot.slane %v400_v46, 5  ;;  %v2886_v41 = vld [vmem:[%s2673_s30 + $0x7c] sm:$0xf] }
  0x44   : > { %v437_v3 = vsel %vm2711_vm2, %v432_v48, %v436_v18  ;;  %v923_v4 = vunpack.c.l.b16 %v427_v55  ;;  %v406_v5 = vrot.slane %v404_v49, 4  ;;  %v412_v6 = vrot.slane %v410_v51, 5  ;;  %v2890_v51 = vld [vmem:[%s2673_s30 + $0x80] sm:$0x1] }
  0x45   : > { %3925 = vst [vmem:[#allocation10_spill] sm:$0xff] %v2860_v54  ;;  %973 = vrot.lane.b32.xlu2 %v2860_v54, %s2584_s4  ;;  %v924_v17 = vunpack.c.l.b16 %v437_v3  ;;  %v398_v11 = vrot.slane %v397_v57, 4  ;;  %v513_v23 = vrot.slane %v511_v50, 4  ;;  %v514_v24 = vshll.u32 %v2850_v32, 16  ;;  %v2896_v3 = vld [vmem:[%s2673_s30 + $0x6c] sm:$0xf] }
  0x46   : > { %v407_v29 = vor.u32 %v406_v5, %v402_v59  ;;  %v520_v31 = vshll.u32 %v2865_v60, 16  ;;  %v524_v18 = vshrl.u32 %v2865_v60, 16  ;;  %v530_v33 = vshll.u32 %v2868_v61, 16  ;;  %v2912_v54 = vld [vmem:[%s2673_s30 + $0x74] sm:$0x1] }
  0x47   : > { %v2881_v34 = vpack.c.b16 %v924_v17, %v923_v4  ;;  %v403_v35 = vsel %vm2711_vm2, %v398_v11, %v402_v59  ;;  %v516_v38 = vrot.slane %v514_v24, 5  ;;  %v487_v42 = vshrl.u32 %v2873_v13, 16 }
  0x48   : > { %v408_v43 = vrot.slane %v407_v29, 4  ;;  %v921_v46 = vunpack.c.l.b16 %v403_v35  ;;  %v522_v48 = vrot.slane %v520_v31, 5  ;;  %v526_v49 = vrot.slane %v524_v18, 4 }
  0x49   : > { %3927 = vst [vmem:[#allocation12_spill] sm:$0xff] %v2881_v34  ;;  %971 = vrot.lane.b32.xlu1 %v2881_v34, %s2584_s4  ;;  %v517_v50 = vor.u32 %v516_v38, %v513_v23  ;;  %v532_v55 = vrot.slane %v530_v33, 5  ;;  %v489_v57 = vrot.slane %v487_v42, 4  ;;  %v490_v59 = vshll.u32 %v2873_v13, 16  ;;  %v2904_v38 = vld [vmem:[%s2673_s30 + $0x70] sm:$0xf] }
  0x4a   : > { %v413_v4 = vsel %vm2711_vm2, %v408_v43, %v412_v6  ;;  %v527_v5 = vor.u32 %v526_v49, %v522_v48  ;;  %v496_v17 = vshll.u32 %v2886_v41, 16  ;;  %v500_v11 = vshrl.u32 %v2886_v41, 16 }
  0x4b   : > { %v922_v24 = vunpack.c.l.b16 %v413_v4  ;;  %v518_v29 = vrot.slane %v517_v50, 4  ;;  %v492_v23 = vrot.slane %v490_v59, 5  ;;  %v506_v31 = vshll.u32 %v2890_v51, 16  ;;  %v2915_v50 = vld [vmem:[%s2673_s30 + $0xa8] sm:$0xf] }
  0x4c   : > { %v528_v18 = vrot.slane %v527_v5, 4  ;;  %v498_v33 = vrot.slane %v496_v17, 5  ;;  %v502_v35 = vrot.slane %v500_v11, 4  ;;  %v463_v42 = vshrl.u32 %v2896_v3, 16  ;;  %3929 = vst [vmem:[#allocation14_spill] sm:$0xff] %v2915_v50 }
  0x4d   : > { %v2907_v6 = vpack.c.b16 %v922_v24, %v921_v46  ;;  %v523_v43 = vsel %vm2711_vm2, %v518_v29, %v522_v48  ;;  %v493_v49 = vor.u32 %v492_v23, %v489_v57  ;;  %v508_v53 = vrot.slane %v506_v31, 5 }
  0x4e   : > { %v533_v59 = vsel %vm2711_vm2, %v528_v18, %v532_v55  ;;  %v931_v4 = vunpack.c.l.b16 %v523_v43  ;;  %v503_v5 = vor.u32 %v502_v35, %v498_v33  ;;  %v465_v17 = vrot.slane %v463_v42, 4  ;;  %v2931_v43 = vld [vmem:[%s2673_s30 + $0xac] sm:$0xf] }
  0x4f   : > { %3928 = vst [vmem:[#allocation13_spill] sm:$0xff] %v2907_v6  ;;  %969 = vrot.lane.b32.xlu0 %v2907_v6, %s2584_s4  ;;  %v932_v46 = vunpack.c.l.b16 %v533_v59  ;;  %v494_v11 = vrot.slane %v493_v49, 4  ;;  %v466_v48 = vshll.u32 %v2896_v3, 16  ;;  %v472_v57 = vshll.u32 %v2904_v38, 16  ;;  %v2934_v49 = vld [vmem:[%s2673_s30 + $0xb0] sm:$0x1] }
  0x50   : > { %v504_v24 = vrot.slane %v503_v5, 4  ;;  %v476_v29 = vshrl.u32 %v2904_v38, 16  ;;  %v482_v55 = vshll.u32 %v2912_v54, 16  ;;  %v583_v23 = vshrl.u32 %v2915_v50, 16  ;;  %3931 = vst [vmem:[#allocation16_spill] sm:$0xff] %v2931_v43 }
  0x51   : > { %v2926_v31 = vpack.c.b16 %v932_v46, %v931_v4  ;;  %v499_v18 = vsel %vm2711_vm2, %v494_v11, %v498_v33  ;;  %v468_v35 = vrot.slane %v466_v48, 5  ;;  %v474_v42 = vrot.slane %v472_v57, 5  ;;  %3932 = vst [vmem:[#allocation17_spill] sm:$0xff] %v2934_v49  ;;  %v2939_v6 = vld [vmem:[%s2673_s30 + $0x9c] sm:$0xf] }
  0x52   : > { %v509_v59 = vsel %vm2711_vm2, %v504_v24, %v508_v53  ;;  %v929_v5 = vunpack.c.l.b16 %v499_v18  ;;  %v478_v34 = vrot.slane %v476_v29, 4  ;;  %v484_v39 = vrot.slane %v482_v55, 5 }
  0x53   : > { %3930 = vst [vmem:[#allocation15_spill] sm:$0xff] %v2926_v31  ;;  %979 = vrot.lane.b32.xlu2 %v2926_v31, %s2584_s4  ;;  %v930_v4 = vunpack.c.l.b16 %v509_v59  ;;  %v469_v33 = vor.u32 %v468_v35, %v465_v17  ;;  %v585_v46 = vrot.slane %v583_v23, 4  ;;  %v586_v11 = vshll.u32 %v2915_v50, 16 }
  0x54   : > { %v479_v48 = vor.u32 %v478_v34, %v474_v42  ;;  %v592_v57 = vshll.u32 %v2931_v43, 16  ;;  %v596_v53 = vshrl.u32 %v2931_v43, 16  ;;  %v602_v24 = vshll.u32 %v2934_v49, 16 }
  0x55   : > { %v2947_v29 = vpack.c.b16 %v930_v4, %v929_v5  ;;  %v470_v55 = vrot.slane %v469_v33, 4  ;;  %v588_v18 = vrot.slane %v586_v11, 5  ;;  %v559_v17 = vshrl.u32 %v2939_v6, 16  ;;  %v2962_v33 = vld [vmem:[%s2673_s30 + $0x90] sm:$0xf] }
  0x56   : > { %v480_v23 = vrot.slane %v479_v48, 4  ;;  %v594_v35 = vrot.slane %v592_v57, 5  ;;  %v598_v59 = vrot.slane %v596_v53, 4  ;;  %v604_v34 = vrot.slane %v602_v24, 5 }
  0x57   : > { %3933 = vst [vmem:[#allocation18_spill] sm:$0xff] %v2947_v29  ;;  %977 = vrot.lane.b32.xlu1 %v2947_v29, %s2584_s4  ;;  %v475_v31 = vsel %vm2711_vm2, %v470_v55, %v474_v42  ;;  %v589_v15 = vor.u32 %v588_v18, %v585_v46  ;;  %v561_v5 = vrot.slane %v559_v17, 4  ;;  %v562_v4 = vshll.u32 %v2939_v6, 16 }
  0x58   : > { %v485_v11 = vsel %vm2711_vm2, %v480_v23, %v484_v39  ;;  %v927_v48 = vunpack.c.l.b16 %v475_v31  ;;  %v599_v57 = vor.u32 %v598_v59, %v594_v35  ;;  %v568_v53 = vshll.u32 %v2950_v12, 16  ;;  %v2975_v59 = vld [vmem:[%s2673_s30 + $0x94] sm:$0xf] }
  0x59   : > { %v928_v24 = vunpack.c.l.b16 %v485_v11  ;;  %v590_v29 = vrot.slane %v589_v15, 4  ;;  %v564_v42 = vrot.slane %v562_v4, 5  ;;  %v572_v46 = vshrl.u32 %v2950_v12, 16  ;;  %v2978_v11 = vld [vmem:[%s2673_s30 + $0x98] sm:$0x1] }
  0x5a   : > { %v600_v55 = vrot.slane %v599_v57, 4  ;;  %v570_v18 = vrot.slane %v568_v53, 5  ;;  %v578_v17 = vshll.u32 %v2958_v28, 16  ;;  %v535_v49 = vshrl.u32 %v2962_v33, 16 }
  0x5b   : > { %v2970_v43 = vpack.c.b16 %v928_v24, %v927_v48  ;;  %v595_v39 = vsel %vm2711_vm2, %v590_v29, %v594_v35  ;;  %v565_v31 = vor.u32 %v564_v42, %v561_v5  ;;  %v574_v23 = vrot.slane %v572_v46, 4 }
  0x5c   : > { %v605_v15 = vsel %vm2711_vm2, %v600_v55, %v604_v34  ;;  %v937_v4 = vunpack.c.l.b16 %v595_v39  ;;  %v580_v57 = vrot.slane %v578_v17, 5  ;;  %v537_v53 = vrot.slane %v535_v49, 4 }
  0x5d   : > { %3934 = vst [vmem:[#allocation19_spill] sm:$0xff] %v2970_v43  ;;  %975 = vrot.lane.b32.xlu0 %v2970_v43, %s2584_s4  ;;  %v938_v48 = vunpack.c.l.b16 %v605_v15  ;;  %v566_v24 = vrot.slane %v565_v31, 4  ;;  %v575_v50 = vor.u32 %v574_v23, %v570_v18  ;;  %v538_v29 = vshll.u32 %v2962_v33, 16 }
  0x5e   : > { %v544_v35 = vshll.u32 %v2975_v59, 16  ;;  %v548_v5 = vshrl.u32 %v2975_v59, 16  ;;  %v554_v42 = vshll.u32 %v2978_v11, 16 }
  0x5f   : > { %v2988_v46 = vpack.c.b16 %v938_v48, %v937_v4  ;;  %v571_v49 = vsel %vm2711_vm2, %v566_v24, %v570_v18  ;;  %v576_v34 = vrot.slane %v575_v50, 4  ;;  %v540_v55 = vrot.slane %v538_v29, 5 }
  0x60   : > { %v935_v17 = vunpack.c.l.b16 %v571_v49  ;;  %v546_v39 = vrot.slane %v544_v35, 5  ;;  %v550_v31 = vrot.slane %v548_v5, 4  ;;  %v556_v23 = vrot.slane %v554_v42, 5 }
  0x61   : > { %985 = vrot.lane.b32.xlu2 %v2988_v46, %s2584_s4  ;;  %v581_v15 = vsel %vm2711_vm2, %v576_v34, %v580_v57  ;;  %v541_v43 = vor.u32 %v540_v55, %v537_v53  ;;  %v2067_v4 = vrot.slane %v2767_v27, 9  ;;  %v690_v18 = vrot.slane %v2775_v40, 5  ;;  %v3012_v34 = vld [vmem:[%s2673_s30 + $0xb4] sm:$0xf] }
  0x62   : > { %v936_v48 = vunpack.c.l.b16 %v581_v15  ;;  %v551_v61 = vor.u32 %v550_v31, %v546_v39  ;;  %v693_v24 = vrot.slane %v2779_v47, 5  ;;  %v2066_v57 = vrot.slane %v2700_v16, 9  ;;  %v3028_v31 = vld [vmem:[%s2673_s30 + $0xbc] sm:$0x1] }
  0x63   : > { %v542_v29 = vrot.slane %v541_v43, 4  ;;  %v683_v53 = vrot.slane %v2707_v25, 5  ;;  %v686_v35 = vrot.slane %v2718_v36, 5  ;;  %v691_v42 = vsel %vm2998_vm5, %v2067_v4, %v690_v18  ;;  %v3019_v43 = vld [vmem:[%s2673_s30 + $0xb8] sm:$0xf] }
  0x64   : > { %v3007_v27 = vpack.c.b16 %v936_v48, %v935_v17  ;;  %v552_v5 = vrot.slane %v551_v61, 4  ;;  %v692_v49 = vrot.slane %v690_v18, 4  ;;  %v991_v47 = vunpack.c.l.b16 %v691_v42 }
  0x65   : > { %v547_v40 = vsel %vm2711_vm2, %v542_v29, %v546_v39  ;;  %v684_v16 = vsel %vm2998_vm5, %v2066_v57, %v683_v53  ;;  %v685_v25 = vrot.slane %v683_v53, 4  ;;  %v607_v48 = vshrl.u32 %v3012_v34, 16 }
  0x66   : > { %983 = vrot.lane.b32.xlu1 %v3007_v27, %s2584_s4  ;;  %v557_v36 = vsel %vm2711_vm2, %v552_v5, %v556_v23  ;;  %v933_v61 = vunpack.c.l.b16 %v547_v40  ;;  %v694_v55 = vsel %vm2998_vm5, %v692_v49, %v693_v24  ;;  %v989_v17 = vunpack.c.l.b16 %v684_v16 }
  0x67   : > { %v934_v39 = vunpack.c.l.b16 %v557_v36  ;;  %v992_v15 = vunpack.c.l.b16 %v694_v55  ;;  %v687_v4 = vsel %vm2998_vm5, %v685_v25, %v686_v35  ;;  %v610_v29 = vshll.u32 %v3012_v34, 16 }
  0x68   : > { %v990_v18 = vunpack.c.l.b16 %v687_v4  ;;  %v616_v57 = vshll.u32 %v3019_v43, 16  ;;  %v620_v23 = vshrl.u32 %v3019_v43, 16  ;;  %v609_v5 = vrot.slane %v607_v48, 4 }
  0x69   : > { %v3036_v53 = vpack.c.b16 %v934_v39, %v933_v61  ;;  %v3038_v24 = vpack.c.b16 %v992_v15, %v991_v47  ;;  %v626_v42 = vshll.u32 %v3028_v31, 16  ;;  %v612_v40 = vrot.slane %v610_v29, 5 }
  0x6a   : > { %v1021_v49 = vpack.c.b16 %v990_v18, %v989_v17  ;;  %v618_v16 = vrot.slane %v616_v57, 5  ;;  %v622_v35 = vrot.slane %v620_v23, 4  ;;  %v2070_v36 = vrot.slane %v2676_v0, 9 }
  0x6b   : > { %981 = vrot.lane.b32.xlu0 %v3036_v53, %s2584_s4  ;;  %1039 = vrot.lane.b32.xlu2 %v3038_v24, %s2585_s5  ;;  %v628_v25 = vrot.slane %v626_v42, 5  ;;  %v711_v47 = vrot.slane %v2679_v1, 5  ;;  %v714_v61 = vrot.slane %v2682_v2, 5  ;;  %v613_v55 = vor.u32 %v612_v40, %v609_v5 }
  0x6c   : > { %v623_v39 = vor.u32 %v622_v35, %v618_v16  ;;  %v2069_v17 = vrot.slane %v2744_v63, 9  ;;  %v704_v15 = vrot.slane %v2754_v14, 5  ;;  %v707_v18 = vrot.slane %v2760_v19, 5 }
  0x6d   : > { %v712_v4 = vsel %vm2998_vm5, %v2070_v36, %v711_v47  ;;  %v713_v48 = vrot.slane %v711_v47, 4  ;;  %v2068_v29 = vrot.slane %v2689_v7, 9  ;;  %v614_v0 = vrot.slane %v613_v55, 4 }
  0x6e   : > { %1037 = vrot.lane.b32.xlu1 %v1021_v49, %s2585_s5  ;;  %v624_v1 = vrot.slane %v623_v39, 4  ;;  %v997_v57 = vunpack.c.l.b16 %v712_v4  ;;  %v705_v2 = vsel %vm2998_vm5, %v2069_v17, %v704_v15  ;;  %v706_v14 = vrot.slane %v704_v15, 4 }
  0x6f   : > { %v715_v63 = vsel %vm2998_vm5, %v713_v48, %v714_v61  ;;  %v995_v23 = vunpack.c.l.b16 %v705_v2  ;;  %v697_v5 = vrot.slane %v2693_v9, 5  ;;  %v619_v19 = vsel %vm2711_vm2, %v614_v0, %v618_v16 }
  0x70   : > { %v629_v7 = vsel %vm2711_vm2, %v624_v1, %v628_v25  ;;  %v998_v42 = vunpack.c.l.b16 %v715_v63  ;;  %v700_v49 = vrot.slane %v2696_v10, 5  ;;  %v939_v40 = vunpack.c.l.b16 %v619_v19 }
  0x71   : > { %v940_v35 = vunpack.c.l.b16 %v629_v7  ;;  %v708_v36 = vsel %vm2998_vm5, %v706_v14, %v707_v18  ;;  %v698_v47 = vsel %vm2998_vm5, %v2068_v29, %v697_v5  ;;  %v699_v55 = vrot.slane %v697_v5, 4 }
  0x72   : > { %v3069_v61 = vpack.c.b16 %v998_v42, %v997_v57  ;;  %v996_v9 = vunpack.c.l.b16 %v708_v36  ;;  %v993_v39 = vunpack.c.l.b16 %v698_v47  ;;  %v2073_v25 = vrot.slane %v2805_v21, 9 }
  0x73   : > { %v3071_v16 = vpack.c.b16 %v940_v35, %v939_v40  ;;  %v732_v17 = vrot.slane %v2816_v37, 5  ;;  %v735_v10 = vrot.slane %v2824_v45, 5  ;;  %v701_v4 = vsel %vm2998_vm5, %v699_v55, %v700_v49 }
  0x74   : > { %1045 = vrot.lane.b32.xlu2 %v3069_v61, %s2585_s5  ;;  %v3078_v15 = vpack.c.b16 %v996_v9, %v995_v23  ;;  %v2072_v48 = vrot.slane %v2831_v58, 9  ;;  %v725_v18 = vrot.slane %v2838_v22, 5  ;;  %v994_v21 = vunpack.c.l.b16 %v701_v4 }
  0x75   : > { %987 = vrot.lane.b32.xlu0 %v3071_v16, %s2584_s4  ;;  %v733_v37 = vsel %vm2998_vm5, %v2073_v25, %v732_v17  ;;  %v734_v45 = vrot.slane %v732_v17, 4  ;;  %v728_v29 = vrot.slane %v2846_v30, 5  ;;  %v2071_v22 = vrot.slane %v2727_v44, 9 }
  0x76   : > { %1043 = vrot.lane.b32.xlu1 %v3078_v15, %s2585_s5  ;;  %v1003_v0 = vunpack.c.l.b16 %v733_v37  ;;  %v726_v1 = vsel %vm2998_vm5, %v2072_v48, %v725_v18  ;;  %v727_v58 = vrot.slane %v725_v18, 4  ;;  %v3094_v57 = vpack.c.b16 %v994_v21, %v993_v39 }
  0x77   : > { %v736_v2 = vsel %vm2998_vm5, %v734_v45, %v735_v10  ;;  %v1001_v63 = vunpack.c.l.b16 %v726_v1  ;;  %v718_v14 = vrot.slane %v2735_v56, 5  ;;  %v721_v5 = vrot.slane %v2741_v62, 5 }
  0x78   : > { %v1004_v23 = vunpack.c.l.b16 %v736_v2  ;;  %v729_v30 = vsel %vm2998_vm5, %v727_v58, %v728_v29  ;;  %v2076_v19 = vrot.slane %v2873_v13, 9  ;;  %v753_v49 = vrot.slane %v2886_v41, 5 }
  0x79   : > { %v1002_v7 = vunpack.c.l.b16 %v729_v30  ;;  %v719_v44 = vsel %vm2998_vm5, %v2071_v22, %v718_v14  ;;  %v720_v42 = vrot.slane %v718_v14, 4  ;;  %v756_v35 = vrot.slane %v2890_v51, 5 }
  0x7a   : > { %v3106_v40 = vpack.c.b16 %v1004_v23, %v1003_v0  ;;  %v2075_v56 = vrot.slane %v2896_v3, 9  ;;  %v754_v13 = vsel %vm2998_vm5, %v2076_v19, %v753_v49  ;;  %v755_v47 = vrot.slane %v753_v49, 4 }
  0x7b   : > { %v3110_v36 = vpack.c.b16 %v1002_v7, %v1001_v63  ;;  %v722_v62 = vsel %vm2998_vm5, %v720_v42, %v721_v5  ;;  %v999_v9 = vunpack.c.l.b16 %v719_v44  ;;  %v1009_v41 = vunpack.c.l.b16 %v754_v13  ;;  %v3937_v7 = vld [vmem:[#allocation11_spill] sm:$0xff] }
  0x7c   : > { %1051 = vrot.lane.b32.xlu2 %v3106_v40, %s2585_s5  ;;  %v746_v55 = vrot.slane %v2904_v38, 5  ;;  %v749_v51 = vrot.slane %v2912_v54, 5  ;;  %v1000_v3 = vunpack.c.l.b16 %v722_v62  ;;  %v757_v39 = vsel %vm2998_vm5, %v755_v47, %v756_v35 }
  0x7d   : > { %1041 = vrot.lane.b32.xlu0 %v3094_v57, %s2585_s5  ;;  %v2074_v25 = vrot.slane %v2786_v52, 9  ;;  %v739_v17 = vrot.slane %v2796_v8, 5  ;;  %v1010_v10 = vunpack.c.l.b16 %v757_v39  ;;  %v742_v54 = vrot.slane %v2802_v20, 5  ;;  %v3939_v39 = vld [vmem:[#allocation16_spill] sm:$0xff] }
  0x7e   : > { %1049 = vrot.lane.b32.xlu1 %v3110_v36, %s2585_s5  ;;  %v747_v38 = vsel %vm2998_vm5, %v2075_v56, %v746_v55  ;;  %v748_v4 = vrot.slane %v746_v55, 4  ;;  %v2079_v21 = vrot.slane %v2939_v6, 9  ;;  %v774_v45 = vrot.slane %v2950_v12, 5  ;;  %v3938_v55 = vld [vmem:[#allocation14_spill] sm:$0xff] }
  0x7f   : > { %v1007_v48 = vunpack.c.l.b16 %v747_v38  ;;  %v741_v18 = vrot.slane %v739_v17, 4  ;;  %v3132_v37 = vpack.c.b16 %v1010_v10, %v1009_v41  ;;  %v740_v8 = vsel %vm2998_vm5, %v2074_v25, %v739_v17  ;;  %v3940_v10 = vld [vmem:[#allocation17_spill] sm:$0xff] }
  0x80   : > { %v750_v52 = vsel %vm2998_vm5, %v748_v4, %v749_v51  ;;  %v3139_v29 = vpack.c.b16 %v1000_v3, %v999_v9  ;;  %v777_v1 = vrot.slane %v2958_v28, 5  ;;  %v2078_v20 = vrot.slane %v2962_v33, 9 }
  0x81   : > { %v1008_v0 = vunpack.c.l.b16 %v750_v52  ;;  %v743_v6 = vsel %vm2998_vm5, %v741_v18, %v742_v54  ;;  %v775_v58 = vsel %vm2998_vm5, %v2079_v21, %v774_v45  ;;  %v776_v22 = vrot.slane %v774_v45, 4 }
  0x82   : > { %v767_v2 = vrot.slane %v2975_v59, 5  ;;  %v1005_v14 = vunpack.c.l.b16 %v740_v8  ;;  %v770_v12 = vrot.slane %v2978_v11, 5  ;;  %v2077_v23 = vrot.slane %v2850_v32, 9 }
  0x83   : > { %v3148_v63 = vpack.c.b16 %v1008_v0, %v1007_v48  ;;  %v778_v28 = vsel %vm2998_vm5, %v776_v22, %v777_v1  ;;  %v1015_v33 = vunpack.c.l.b16 %v775_v58  ;;  %v1006_v59 = vunpack.c.l.b16 %v743_v6  ;;  %v2186_v1 = vld [vmem:[%s2673_s30 + $0xc] sm:$0xff]  ;;  %v966_v58 = vpop.permute.xlu2 %965 }
  0x84   : > { %1057 = vrot.lane.b32.xlu2 %v3132_v37, %s2585_s5  ;;  %v768_v30 = vsel %vm2998_vm5, %v2078_v20, %v767_v2  ;;  %v769_v5 = vrot.slane %v767_v2, 4  ;;  %v1016_v19 = vunpack.c.l.b16 %v778_v28  ;;  %v760_v11 = vrot.slane %v2865_v60, 5  ;;  %v3209_v22 = vld [vmem:[%s2673_s30 + $0x30] sm:$0xff]  ;;  %v3212_v2 = vld [vmem:[%s2673_s30 + $0x24] sm:$0xff] }
  0x85   : > { %1047 = vrot.lane.b32.xlu0 %v3139_v29, %s2585_s5  ;;  %v763_v32 = vrot.slane %v3937_v7, 5  ;;  %v1013_v42 = vunpack.c.l.b16 %v768_v30  ;;  %v2081_v49 = vrot.slane %v3012_v34, 9  ;;  %v788_v35 = vrot.slane %v3019_v43, 5  ;;  %v2191_v28 = vld [vmem:[%s2673_s30 + $0x48] sm:$0xff]  ;;  %v2195_v30 = vld [vmem:[%s2673_s30 + $0x78] sm:$0xff]  ;;  %v3251_v7 = vld [vmem:[%s2673_s30 + $0x60] sm:$0xff] }
  0x86   : > { %1055 = vrot.lane.b32.xlu1 %v3148_v63, %s2585_s5  ;;  %v771_v44 = vsel %vm2998_vm5, %v769_v5, %v770_v12  ;;  %v761_v62 = vsel %vm2998_vm5, %v2077_v23, %v760_v11  ;;  %v762_v13 = vrot.slane %v760_v11, 4  ;;  %v791_v60 = vrot.slane %v3028_v31, 5  ;;  %v3223_v12 = vld [vmem:[%s2673_s30 + $0x54] sm:$0xff]  ;;  %v3238_v5 = vld [vmem:[%s2673_s30 + $0x3c] sm:$0xff] }
  0x87   : > { %v1014_v56 = vunpack.c.l.b16 %v771_v44  ;;  %v3171_v47 = vpack.c.b16 %v1016_v19, %v1015_v33  ;;  %v1011_v9 = vunpack.c.l.b16 %v761_v62  ;;  %v790_v41 = vrot.slane %v788_v35, 4  ;;  %v3226_v23 = vld [vmem:[%s2673_s30 + $0x18] sm:$0xff]  ;;  %v3241_v19 = vld [vmem:[%s2673_s30 + $0x6c] sm:$0xff] }
  0x88   : > { %v2080_v51 = vrot.slane %v3938_v55, 9  ;;  %v3174_v3 = vpack.c.b16 %v1006_v59, %v1005_v14  ;;  %v764_v34 = vsel %vm2998_vm5, %v762_v13, %v763_v32  ;;  %v781_v43 = vrot.slane %v3939_v39, 5  ;;  %v3266_v62 = vld [vmem:[%s2673_s30 + $0xa8] sm:$0xff] }
  0x89   : > { %v3179_v25 = vpack.c.b16 %v1014_v56, %v1013_v42  ;;  %v1012_v17 = vunpack.c.l.b16 %v764_v34  ;;  %v784_v38 = vrot.slane %v3940_v10, 5  ;;  %v789_v31 = vsel %vm2998_vm5, %v2081_v49, %v788_v35  ;;  %v3941_v35 = vld [vmem:[#allocation19_spill] sm:$0xff]  ;;  %v3263_v56 = vld [vmem:[%s2673_s30 + $0x9c] sm:$0xff]  ;;  %v3942_v34 = vld [vmem:[#allocation18_spill] sm:$0xff] }
  0x8a   : > { %v792_v4 = vsel %vm2998_vm5, %v790_v41, %v791_v60  ;;  %v782_v54 = vsel %vm2998_vm5, %v2080_v51, %v781_v43  ;;  %v783_v48 = vrot.slane %v781_v43, 4  ;;  %v1019_v8 = vunpack.c.l.b16 %v789_v31  ;;  %v3943_v10 = vld [vmem:[#allocation9_spill] sm:$0xff] }
  0x8b   : > { %v3190_v18 = vpack.c.b16 %v1012_v17, %v1011_v9  ;;  %v1017_v21 = vunpack.c.l.b16 %v782_v54  ;;  %v1020_v45 = vunpack.c.l.b16 %v792_v4 }
  0x8c   : > { %1063 = vrot.lane.b32.xlu2 %v3171_v47, %s2585_s5  ;;  %v785_v52 = vsel %vm2998_vm5, %v783_v48, %v784_v38  ;;  %v1294_v38 = vsel %vm1279_vm6, %v3209_v22, %v966_v58 }
  0x8d   : > { %1053 = vrot.lane.b32.xlu0 %v3174_v3, %s2585_s5  ;;  %v1018_v0 = vunpack.c.l.b16 %v785_v52  ;;  %v3201_v6 = vpack.c.b16 %v1020_v45, %v1019_v8  ;;  %v2185_v45 = vld [vmem:[%s2673_s30] sm:$0xff] }
  0x8e   : > { %1061 = vrot.lane.b32.xlu1 %v3179_v25, %s2585_s5 }
  0x8f   : > { %v3199_v20 = vpack.c.b16 %v1018_v0, %v1017_v21  ;;  %v3944_v0 = vld [vmem:[#allocation6_spill] sm:$0xff] }
  0x91   : > { %v3218_v14 = vpop.permute.xlu2 %967 }
  0x94   : > { %1072 = vrot.lane.b32.xlu2 %v2186_v1, %s2586_s6 }
  0x95   : > { %1059 = vrot.lane.b32.xlu0 %v3190_v18, %s2585_s5 }
  0x96   : > { %1067 = vrot.lane.b32.xlu1 %v3201_v6, %s2585_s5 }
  0x9c   : > { %1078 = vrot.lane.b32.xlu2 %v3209_v22, %s2586_s6 }
  0x9d   : > { %1065 = vrot.lane.b32.xlu0 %v3199_v20, %s2585_s5 }
  0x9e   : > { %1076 = vrot.lane.b32.xlu1 %v3212_v2, %s2586_s6 }
  0x9f   : > { %v3234_v33 = vpop.permute.xlu2 %973  ;;  %v3243_v11 = vpop.permute.xlu1 %961 }
  0xa3   : > { %v958_v59 = vpop.permute.xlu0 %957 }
  0xa4   : > { %1084 = vrot.lane.b32.xlu2 %v3223_v12, %s2586_s6 }
  0xa5   : > { %1074 = vrot.lane.b32.xlu0 %v3226_v23, %s2586_s6 }
  0xa6   : > { %1082 = vrot.lane.b32.xlu1 %v2191_v28, %s2586_s6 }
  0xac   : > { %1090 = vrot.lane.b32.xlu2 %v2195_v30, %s2586_s6 }
  0xad   : > { %1080 = vrot.lane.b32.xlu0 %v3238_v5, %s2586_s6  ;;  %v3253_v32 = vpop.permute.xlu2 %979  ;;  %v964_v49 = vpop.permute.xlu1 %963 }
  0xae   : > { %1088 = vrot.lane.b32.xlu1 %v3241_v19, %s2586_s6 }
  0xb3   : > { %v960_v44 = vpop.permute.xlu0 %959 }
  0xb4   : > { %1131 = vrot.lane.b32.xlu2 %v3007_v27, %s2587_s7  ;;  %v1285_v42 = vsel %vm1279_vm6, %v2186_v1, %v960_v44  ;;  %v3945_v1 = vld [vmem:[#allocation7_spill] sm:$0xff] }
  0xb5   : > { %1086 = vrot.lane.b32.xlu0 %v3251_v7, %s2586_s6 }
  0xb6   : > { %1123 = vrot.lane.b32.xlu1 %v3941_v35, %s2587_s7 }
  0xbb   : > { %v986_v13 = vpop.permute.xlu2 %985  ;;  %v972_v9 = vpop.permute.xlu1 %971 }
  0xbc   : > { %1193 = vrot.lane.b32.xlu2 %v2195_v30, %s2588_s8  ;;  %v3271_v60 = vsel %vm1279_vm6, %v3266_v62, %v986_v13  ;;  %v1303_v48 = vsel %vm1279_vm6, %v3223_v12, %v972_v9  ;;  %v3324_v9 = vld [vmem:[%s2673_s30 + $0xb4] sm:$0xff] }
  0xbd   : > { %1096 = vrot.lane.b32.xlu0 %v3263_v56, %s2586_s6 }
  0xbe   : > { %1166 = vrot.lane.b32.xlu1 %v3171_v47, %s2589_s9 }
  0xc1   : > { %v970_v41 = vpop.permute.xlu0 %969 }
  0xc2   : > { %v1300_v55 = vsel %vm1279_vm6, %v2191_v28, %v970_v41 }
  0xc4   : > { %1236 = vrot.lane.b32.xlu2 %v2988_v46, %s2590_s10 }
  0xc5   : > { %1158 = vrot.lane.b32.xlu0 %v3148_v63, %s2589_s9  ;;  %v1040_v51 = vpop.permute.xlu2 %1039 }
  0xc6   : > { %1228 = vrot.lane.b32.xlu1 %v3942_v34, %s2590_s10  ;;  %v3285_v39 = vsel %vm1328_vm7, %v1285_v42, %v1040_v51 }
  0xc9   : > { %v978_v43 = vpop.permute.xlu1 %977 }
  0xca   : > { %v1312_v17 = vsel %vm1279_vm6, %v2195_v30, %v978_v43  ;;  %v1291_v43 = vsel %vm1279_vm6, %v3212_v2, %v964_v49  ;;  %v1288_v49 = vsel %vm1279_vm6, %v3226_v23, %v3243_v11  ;;  %v1297_v11 = vsel %vm1279_vm6, %v3238_v5, %v3218_v14 }
  0xcc   : > { %1107 = vrot.lane.b32.xlu2 %v3943_v10, %s2587_s7 }
  0xcd   : > { %1201 = vrot.lane.b32.xlu0 %v3266_v62, %s2588_s8 }
  0xce   : > { %1271 = vrot.lane.b32.xlu1 %v3199_v20, %s2591_s11  ;;  %v1046_v31 = vpop.permute.xlu2 %1045 }
  0xcf   : > { %v3297_v4 = vsel %vm1328_vm7, %v1294_v38, %v1046_v31  ;;  %v976_v54 = vpop.permute.xlu0 %975  ;;  %v3946_v31 = vld [vmem:[#allocation13_spill] sm:$0xff] }
  0xd4   : > { %1150 = vrot.lane.b32.xlu2 %v3139_v29, %s2589_s9 }
  0xd5   : > { %1263 = vrot.lane.b32.xlu0 %v3132_v37, %s2591_s11 }
  0xd6   : > { %1142 = vrot.lane.b32.xlu1 %v3038_v24, %s2589_s9  ;;  %v1052_v21 = vpop.permute.xlu2 %1051  ;;  %v1282_v24 = vsel %vm1279_vm6, %v2185_v45, %v958_v59 }
  0xd7   : > { %v3308_v52 = vsel %vm1328_vm7, %v1303_v48, %v1052_v21 }
  0xd8   : > { %v984_v8 = vpop.permute.xlu1 %983 }
  0xdc   : > { %1212 = vrot.lane.b32.xlu2 %v3944_v0, %s2590_s10 }
  0xdd   : > { %1115 = vrot.lane.b32.xlu0 %v3945_v1, %s2587_s7  ;;  %v3315_v58 = vpop.permute.xlu0 %981 }
  0xde   : > { %1185 = vrot.lane.b32.xlu1 %v2191_v28, %s2588_s8  ;;  %v1058_v30 = vpop.permute.xlu2 %1057  ;;  %v1321_v28 = vsel %vm1279_vm6, %v3263_v56, %v984_v8 }
  0xdf   : > { %v3319_v44 = vsel %vm1328_vm7, %v1312_v17, %v1058_v30 }
  0xe0   : > { %v1038_v42 = vpop.permute.xlu1 %1037 }
  0xe1   : > { %v1330_v13 = vsel %vm1328_vm7, %v1282_v24, %v1038_v42  ;;  %v3357_v24 = vld [vmem:[%s2673_s30 + $0x84] sm:$0xff] }
  0xe4   : > { %1255 = vrot.lane.b32.xlu2 %v3110_v36, %s2591_s11 }
  0xe5   : > { %1177 = vrot.lane.b32.xlu0 %v3226_v23, %s2588_s8 }
  0xe6   : > { %1247 = vrot.lane.b32.xlu1 %v3094_v57, %s2591_s11  ;;  %v1064_v41 = vpop.permute.xlu2 %1063 }
  0xe7   : > { %v988_v51 = vpop.permute.xlu0 %987  ;;  %v3335_v59 = vsel %vm1328_vm7, %v1321_v28, %v1064_v41  ;;  %v1306_v41 = vsel %vm1279_vm6, %v3251_v7, %v3234_v33  ;;  %v1315_v33 = vsel %vm1279_vm6, %v3357_v24, %v3253_v32 }
  0xe8   : > { %v1327_v17 = vsel %vm1279_vm6, %v3324_v9, %v988_v51  ;;  %v1044_v10 = vpop.permute.xlu1 %1043 }
  0xe9   : > { %v1336_v38 = vsel %vm1328_vm7, %v1291_v43, %v1044_v10 }
  0xec   : > { %1133 = vrot.lane.b32.xlu2 %v2988_v46, %s2587_s7 }
  0xed   : > { %1220 = vrot.lane.b32.xlu0 %v3946_v31, %s2590_s10 }
  0xee   : > { %1125 = vrot.lane.b32.xlu1 %v3942_v34, %s2587_s7  ;;  %v1073_v48 = vpop.permute.xlu2 %1072 }
  0xef   : > { %v1042_v21 = vpop.permute.xlu0 %1041  ;;  %v3352_v8 = vsel %vm1361_vm8, %v1330_v13, %v1073_v48 }
  0xf0   : > { %v1334_v45 = vsel %vm1328_vm7, %v1288_v49, %v1042_v21  ;;  %v1050_v30 = vpop.permute.xlu1 %1049 }
  0xf1   : > { %v1342_v46 = vsel %vm1328_vm7, %v1300_v55, %v1050_v30  ;;  %v1309_v55 = vsel %vm1279_vm6, %v3241_v19, %v976_v54 }
  0xf4   : > { %1195 = vrot.lane.b32.xlu2 %v3357_v24, %s2588_s8 }
  0xf5   : > { %1098 = vrot.lane.b32.xlu0 %v3266_v62, %s2586_s6 }
  0xf6   : > { %1168 = vrot.lane.b32.xlu1 %v3199_v20, %s2589_s9  ;;  %v1079_v23 = vpop.permute.xlu2 %1078  ;;  %v3948_v20 = vld [vmem:[#allocation15_spill] sm:$0xff] }
  0xf7   : > { %v1048_v34 = vpop.permute.xlu0 %1047  ;;  %v3369_v42 = vsel %vm1361_vm8, %v1336_v38, %v1079_v23 }
  0xf8   : > { %3947 = vst [vmem:[#allocation11_spill] sm:$0xff] %v3369_v42  ;;  %v1340_v13 = vsel %vm1328_vm7, %v1297_v11, %v1048_v34  ;;  %v1056_v28 = vpop.permute.xlu1 %1055  ;;  %v3951_v11 = vld [vmem:[#allocation8_spill] sm:$0xff] }
  0xf9   : > { %v1348_v62 = vsel %vm1328_vm7, %v1309_v55, %v1056_v28 }
  0xfc   : > { %1238 = vrot.lane.b32.xlu2 %v3071_v16, %s2590_s10 }
  0xfd   : > { %1160 = vrot.lane.b32.xlu0 %v3132_v37, %s2589_s9 }
  0xfe   : > { %1230 = vrot.lane.b32.xlu1 %v3948_v20, %s2590_s10  ;;  %v1085_v14 = vpop.permute.xlu2 %1084 }
  0xff   : > { %v1054_v54 = vpop.permute.xlu0 %1053  ;;  %v3385_v51 = vsel %vm1361_vm8, %v1342_v46, %v1085_v14  ;;  %v2204_v14 = vld [vmem:[%s3888_s1 + $0x8] sm:$0xff] }
 0x100   : > { %v3388_v43 = vsel %vm1328_vm7, %v1306_v41, %v1054_v54  ;;  %v3390_v10 = vpop.permute.xlu1 %1061  ;;  %v3952_v41 = vld [vmem:[#allocation12_spill] sm:$0xff] }
 0x104   : > { %1109 = vrot.lane.b32.xlu2 %v3944_v0, %s2587_s7 }
 0x105   : > { %1203 = vrot.lane.b32.xlu0 %v3324_v9, %s2588_s8 }
 0x106   : > { %1273 = vrot.lane.b32.xlu1 %v3201_v6, %s2591_s11  ;;  %v1091_v37 = vpop.permute.xlu2 %1090 }
 0x107   : > { %v1060_v38 = vpop.permute.xlu0 %1059  ;;  %v3402_v48 = vsel %vm1361_vm8, %v1348_v62, %v1091_v37 }
 0x108   : > { %v3405_v49 = vsel %vm1328_vm7, %v1315_v33, %v1060_v38  ;;  %v1068_v21 = vpop.permute.xlu1 %1067  ;;  %v237_v33 = vld [vmem:[%s2673_s30 + $0xc0] sm:$0xf]  ;;  %v238_v38 = vld [vmem:[%s2673_s30 + $0xc4] sm:$0xf] }
 0x109   : > { %3949 = vst [vmem:[#allocation14_spill] sm:$0xff] %v3405_v49  ;;  %v3408_v0 = vsel %vm1328_vm7, %v1327_v17, %v1068_v21 }
 0x10a   : > { %3950 = vst [vmem:[#allocation16_spill] sm:$0xff] %v3408_v0 }
 0x10c   : > { %1152 = vrot.lane.b32.xlu2 %v3110_v36, %s2589_s9 }
 0x10d   : > { %1265 = vrot.lane.b32.xlu0 %v3190_v18, %s2591_s11 }
 0x10e   : > { %1144 = vrot.lane.b32.xlu1 %v3094_v57, %s2589_s9  ;;  %v3416_v32 = vpop.permute.xlu2 %1131 }
 0x10f   : > { %v1066_v30 = vpop.permute.xlu0 %1065 }
 0x110   : > { %v3420_v46 = vsel %vm1328_vm7, %v3271_v60, %v1066_v30  ;;  %v1077_v23 = vpop.permute.xlu1 %1076  ;;  %v822_v30 = vrot.slane %v238_v38, 5 }
 0x111   : > { %v3423_v17 = vsel %vm1361_vm8, %v1334_v45, %v1077_v23  ;;  %v1563_v45 = vld [vmem:[%s3888_s1 + $0x10] sm:$0x3]  ;;  %v794_v23 = vshrl.u32 %v237_v33, 16 }
 0x112   : > { %v1577_v28 = vunpack.c.l.b16 %v1563_v45  ;;  %v239_v45 = vld [vmem:[%s2673_s30 + $0xc8] sm:$0x1] }
 0x114   : > { %1214 = vrot.lane.b32.xlu2 %v3951_v11, %s2590_s10 }
 0x115   : > { %1117 = vrot.lane.b32.xlu0 %v3946_v31, %s2587_s7  ;;  %v1580_v31 = vpack.c.b16 %v1577_v28, %v1577_v28  ;;  %v2082_v28 = vrot.slane %v237_v33, 9 }
 0x116   : > { %1187 = vrot.lane.b32.xlu1 %v3223_v12, %s2588_s8  ;;  %v3431_v57 = vpop.permute.xlu2 %1193 }
 0x117   : > { %v1075_v36 = vpop.permute.xlu0 %1074  ;;  %v1618_v12 = vsel %vm1616_vm9, %v1580_v31, 0  ;;  %v824_v31 = vrot.slane %v822_v30, 4 }
 0x118   : > { %v3435_v60 = vsel %vm1361_vm8, %v3285_v39, %v1075_v36  ;;  %v1083_v34 = vpop.permute.xlu1 %1082  ;;  %2302 = vmatpush.bf16.msra.mxu2 %v1618_v12  ;;  %2303 = vmatpush.bf16.msra.mxu3 %v1618_v12  ;;  %v797_v36 = vshll.u32 %v237_v33, 16  ;;  %v3491_v33 = vld [vmem:[%s2673_s30 + $0xc0] sm:$0xff] }
 0x119   : > { %v3441_v55 = vsel %vm1361_vm8, %v1340_v13, %v1083_v34  ;;  %1625 = vmatpush.bf16.msra.mxu0 %v1618_v12  ;;  %2301 = vmatpush.bf16.msra.mxu1 %v1618_v12  ;;  %v807_v34 = vshrl.u32 %v238_v38, 16 }
 0x11c   : > { %1257 = vrot.lane.b32.xlu2 %v3106_v40, %s2591_s11  ;;  %2305 = vmatpush.bf16.msra.mxu2 %v2204_v14 }
 0x11d   : > { %1179 = vrot.lane.b32.xlu0 %v3212_v2, %s2588_s8  ;;  %2306 = vmatpush.bf16.msra.mxu3 %v2204_v14  ;;  %v2203_v2 = vld [vmem:[%s3888_s1] sm:$0xff] }
 0x11e   : > { %1249 = vrot.lane.b32.xlu1 %v3078_v15, %s2591_s11  ;;  %v3449_v39 = vpop.permute.xlu2 %1236  ;;  %1626 = vmatpush.bf16.msra.mxu0 %v2204_v14 }
 0x11f   : > { %v3451_v62 = vpop.permute.xlu0 %1080  ;;  %2304 = vmatpush.bf16.msra.mxu1 %v2204_v14  ;;  %v796_v14 = vrot.slane %v794_v23, 4 }
 0x120   : > { %v3453_v13 = vpop.permute.xlu1 %1088  ;;  %2308 = vmatpush.bf16.msra.mxu2 %v2203_v2 }
 0x121   : > { %2309 = vmatpush.bf16.msra.mxu3 %v2203_v2 }
 0x122   : > { %1627 = vmatpush.bf16.msra.mxu0 %v2203_v2 }
 0x123   : > { %2307 = vmatpush.bf16.msra.mxu1 %v2203_v2  ;;  %v799_v2 = vrot.slane %v797_v36, 5 }
 0x124   : > { %1127 = vrot.lane.b32.xlu2 %v3948_v20, %s2587_s7 }
 0x125   : > { %1222 = vrot.lane.b32.xlu0 %v3952_v41, %s2590_s10  ;;  %v800_v0 = vor.u32 %v799_v2, %v796_v14 }
 0x126   : > { %1100 = vrot.lane.b32.xlu1 %v3324_v9, %s2586_s6  ;;  %v3467_v54 = vpop.permute.xlu2 %1107  ;;  %v803_v9 = vshll.u32 %v238_v38, 16  ;;  %v809_v38 = vrot.slane %v807_v34, 4 }
 0x127   : > { %v1087_v37 = vpop.permute.xlu0 %1086  ;;  %v801_v34 = vrot.slane %v800_v0, 4 }
 0x128   : > { %v3473_v20 = vsel %vm1361_vm8, %v3308_v52, %v1087_v37  ;;  %v3475_v21 = vpop.permute.xlu1 %1123  ;;  %v825_v52 = vrot.slane %v239_v45, 5  ;;  %v805_v37 = vrot.slane %v803_v9, 5  ;;  %v3496_v9 = vld [vmem:[%s2673_s30 + $0x90] sm:$0xff] }
 0x129   : > { %3953 = vst [vmem:[#allocation17_spill] sm:$0xff] %v3473_v20  ;;  %v823_v20 = vsel %vm2998_vm5, %v2082_v28, %v822_v30 }
 0x12a   : > { %v810_v49 = vor.u32 %v809_v38, %v805_v37  ;;  %v1139_v23 = vunpack.c.l.b16 %v823_v20  ;;  %v1318_v20 = vsel %vm1279_vm6, %v3496_v9, %v3315_v58 }
 0x12b   : > { %v1354_v2 = vsel %vm1328_vm7, %v1318_v20, %v3390_v10 }
 0x12c   : > { %1170 = vrot.lane.b32.xlu2 %v3201_v6, %s2589_s9  ;;  %v811_v28 = vrot.slane %v810_v49, 4 }
 0x12d   : > { %1092 = vrot.lane.b32.xlu0 %v3357_v24, %s2586_s6  ;;  %v826_v24 = vsel %vm2998_vm5, %v824_v31, %v825_v52 }
 0x12e   : > { %1162 = vrot.lane.b32.xlu1 %v3190_v18, %s2589_s9  ;;  %v3484_v12 = vpop.permute.xlu2 %1150  ;;  %v813_v18 = vshll.u32 %v239_v45, 16  ;;  %v1140_v36 = vunpack.c.l.b16 %v826_v24 }
 0x12f   : > { %v1097_v42 = vpop.permute.xlu0 %1096 }
 0x130   : > { %v1167_v6 = vpop.permute.xlu1 %1166  ;;  %v815_v31 = vrot.slane %v813_v18, 5  ;;  %v3504_v14 = vpack.c.b16 %v1140_v36, %v1139_v23  ;;  %v1387_v49 = vsel %vm1361_vm8, %v1354_v2, %v1097_v42  ;;  %v1379_v36 = vsel %vm1361_vm8, %v3388_v43, %v3453_v13 }
 0x131   : > { %v1420_v10 = vsel %vm1394_vm10, %v1387_v49, %v3416_v32  ;;  %v3572_v49 = vld [vmem:[%s2673_s30 + $0xcc] sm:$0xf] }
 0x132   : > { %v816_v38 = vsel %vm2711_vm2, %v811_v28, %v815_v31  ;;  %v1453_v42 = vsel %vm1427_vm11, %v1420_v10, %v1167_v6  ;;  %v1412_v28 = vsel %vm1394_vm10, %v1379_v36, %v3475_v21  ;;  %v828_v10 = vshrl.u32 %v3572_v49, 16 }
 0x133   : > { %v1105_v0 = vunpack.c.l.b16 %v816_v38 }
 0x134   : > { %1232 = vrot.lane.b32.xlu2 %v3036_v53, %s2590_s10 }
 0x135   : > { %1135 = vrot.lane.b32.xlu0 %v3071_v16, %s2587_s7  ;;  %v806_v16 = vsel %vm2711_vm2, %v801_v34, %v805_v37 }
 0x136   : > { %1205 = vrot.lane.b32.xlu1 %v3491_v33, %s2588_s8  ;;  %v3502_v30 = vpop.permute.xlu2 %1212  ;;  %v1104_v58 = vunpack.c.l.b16 %v806_v16 }
 0x137   : > { %v1159_v52 = vpop.permute.xlu0 %1158 }
 0x138   : > { %v1229_v45 = vpop.permute.xlu1 %1228  ;;  %v1106_v32 = vpack.c.b16 %v1105_v0, %v1104_v58  ;;  %v1445_v31 = vsel %vm1427_vm11, %v1412_v28, %v1159_v52  ;;  %v3575_v58 = vld [vmem:[%s2673_s30 + $0xd0] sm:$0xf] }
 0x139   : > { %v1478_v43 = vsel %vm1460_vm13, %v1445_v31, %v3431_v57 }
 0x13a   : > { %v1511_v13 = vsel %vm1493_vm12, %v1478_v43, %v1229_v45  ;;  %v3954_v45 = vld [vmem:[#allocation10_spill] sm:$0xff] }
 0x13c   : > { %1275 = vrot.lane.b32.xlu2 %v3504_v14, %s2591_s11 }
 0x13d   : > { %1197 = vrot.lane.b32.xlu0 %v3496_v9, %s2588_s8 }
 0x13e   : > { %1267 = vrot.lane.b32.xlu1 %v3179_v25, %s2591_s11  ;;  %v3524_v37 = vpop.permute.xlu2 %1255 }
 0x13f   : > { %v1202_v24 = vpop.permute.xlu0 %1201 }
 0x140   : > { %v1486_v18 = vsel %vm1460_vm13, %v1453_v42, %v1202_v24  ;;  %v1272_v23 = vpop.permute.xlu1 %1271  ;;  %v831_v42 = vshll.u32 %v3572_v49, 16  ;;  %v837_v24 = vshll.u32 %v3575_v58, 16 }
 0x141   : > { %v1519_v34 = vsel %vm1493_vm12, %v1486_v18, %v3449_v39  ;;  %v841_v18 = vshrl.u32 %v3575_v58, 16 }
 0x142   : > { %v1552_v6 = vsel %vm1526_vm14, %v1519_v34, %v1272_v23  ;;  %v830_v34 = vrot.slane %v828_v10, 4  ;;  %v833_v28 = vrot.slane %v831_v42, 5  ;;  %v856_v10 = vrot.slane %v3575_v58, 5 }
 0x143   : > { %2176 = vmatmul.msk.bf16.vlgmr.msra.gmra.mxu3 %vm1583_vm15, %v1552_v6  ;;  %v839_v6 = vrot.slane %v837_v24, 5  ;;  %v843_v31 = vrot.slane %v841_v18, 4 }
 0x144   : > { %1146 = vrot.lane.b32.xlu2 %v3078_v15, %s2589_s9  ;;  %v858_v42 = vrot.slane %v856_v10, 4 }
 0x145   : > { %1240 = vrot.lane.b32.xlu0 %v1106_v32, %s2590_s10 }
 0x146   : > { %1119 = vrot.lane.b32.xlu1 %v3952_v41, %s2587_s7  ;;  %v3545_v39 = vpop.permute.xlu2 %1133 }
 0x147   : > { %v1264_v21 = vpop.permute.xlu0 %1263 }
 0x148   : > { %v1544_v52 = vsel %vm1526_vm14, %v1511_v13, %v1264_v21  ;;  %v1143_v20 = vpop.permute.xlu1 %1142  ;;  %v834_v21 = vor.u32 %v833_v28, %v830_v34 }
 0x149   : > { %2172 = vmatmul.msk.bf16.vlgmr.msra.gmra.mxu2 %vm1583_vm15, %v1544_v52  ;;  %v844_v52 = vor.u32 %v843_v31, %v839_v6 }
 0x14c   : > { %1189 = vrot.lane.b32.xlu2 %v3251_v7, %s2588_s8  ;;  %v1396_v7 = vsel %vm1394_vm10, %v3352_v8, %v3467_v54 }
 0x14d   : > { %1111 = vrot.lane.b32.xlu0 %v3951_v11, %s2587_s7 }
 0x14e   : > { %1181 = vrot.lane.b32.xlu1 %v3209_v22, %s2588_s8  ;;  %v3556_v15 = vpop.permute.xlu2 %1195  ;;  %v1429_v22 = vsel %vm1427_vm11, %v1396_v7, %v1143_v20  ;;  %v845_v7 = vrot.slane %v844_v52, 4 }
 0x14f   : > { %v1116_v57 = vpop.permute.xlu0 %1115 }
 0x150   : > { %v1186_v41 = vpop.permute.xlu1 %1185 }
 0x154   : > { %1251 = vrot.lane.b32.xlu2 %v3069_v61, %s2591_s11 }
 0x155   : > { %1154 = vrot.lane.b32.xlu0 %v3106_v40, %s2589_s9  ;;  %v1371_v40 = vsel %vm1361_vm8, %v3297_v4, %v3451_v62  ;;  %v3955_v62 = vld [vmem:[#allocation5_spill] sm:$0xff] }
 0x156   : > { %1224 = vrot.lane.b32.xlu1 %v3954_v45, %s2590_s10  ;;  %v3567_v11 = vpop.permute.xlu2 %1238  ;;  %v1404_v54 = vsel %vm1394_vm10, %v1371_v40, %v1116_v57 }
 0x157   : > { %v1178_v2 = vpop.permute.xlu0 %1177  ;;  %v1437_v4 = vsel %vm1427_vm11, %v1404_v54, %v3484_v12  ;;  %v242_v12 = vld [vmem:[%s2673_s30 + $0xd4] sm:$0x1] }
 0x158   : > { %v1462_v16 = vsel %vm1460_vm13, %v1429_v22, %v1178_v2  ;;  %v1248_v38 = vpop.permute.xlu1 %1247  ;;  %v2202_v2 = vld [vmem:[%s2673_s30 + $0xcc] sm:$0xff]  ;;  %v859_v24 = vrot.slane %v242_v12, 5  ;;  %s175_s30 = sand.u32 1, %s2566_s13  }
 0x159   : > { %v1495_v8 = vsel %vm1493_vm12, %v1462_v16, %v3502_v30  ;;  %v1470_v30 = vsel %vm1460_vm13, %v1437_v4, %v1186_v41  ;;  %v835_v41 = vrot.slane %v834_v21, 4  ;;  %s2064_s5 = sshll.u32 %s175_s30, 7 }
 0x15a   : > { %v1528_v0 = vsel %vm1526_vm14, %v1495_v8, %v1248_v38 }
 0x15b   : > { %2164 = vmatmul.msk.bf16.vlgmr.msra.gmra.mxu0 %vm1583_vm15, %v1528_v0  ;;  %v840_v16 = vsel %vm2711_vm2, %v835_v41, %v839_v6 }
 0x15c   : > { %1102 = vrot.lane.b32.xlu2 %v3491_v33, %s2586_s6 }
 0x15d   : > { %1216 = vrot.lane.b32.xlu0 %v3955_v62, %s2590_s10 }
 0x15e   : > { %1094 = vrot.lane.b32.xlu1 %v3496_v9, %s2586_s6  ;;  %v3598_v23 = vpop.permute.xlu2 %1109  ;;  %v847_v9 = vshll.u32 %v242_v12, 16  ;;  %s3759_s6 = scalar_lea.vmem [#allocation2], %s2064_s5 }
 0x15f   : > { %v1221_v36 = vpop.permute.xlu0 %1220 }
 0x160   : > { %v1503_v33 = vsel %vm1493_vm12, %v1470_v30, %v1221_v36  ;;  %v1126_v43 = vpop.permute.xlu1 %1125  ;;  %v849_v22 = vrot.slane %v847_v9, 5  ;;  %v860_v36 = vsel %vm2998_vm5, %v858_v42, %v859_v24 }
 0x161   : > { %v1536_v13 = vsel %vm1526_vm14, %v1503_v33, %v3524_v37 }
 0x162   : > { %2168 = vmatmul.msk.bf16.vlgmr.msra.gmra.mxu1 %vm1583_vm15, %v1536_v13  ;;  %v850_v38 = vsel %vm2711_vm2, %v845_v7, %v849_v22 }
 0x164   : > { %1164 = vrot.lane.b32.xlu2 %v3179_v25, %s2589_s9  ;;  %v1209_v25 = vunpack.c.l.b16 %v840_v16 }
 0x165   : > { %1259 = vrot.lane.b32.xlu0 %v3174_v3, %s2591_s11 }
 0x166   : > { %1137 = vrot.lane.b32.xlu1 %v1106_v32, %s2587_s7  ;;  %v3610_v20 = vpop.permute.xlu2 %1152  ;;  %v1210_v32 = vunpack.c.l.b16 %v850_v38 }
 0x167   : > { %v1099_v57 = vpop.permute.xlu0 %1098 }
 0x168   : > { %v1169_v37 = vpop.permute.xlu1 %1168  ;;  %v1211_v0 = vpack.c.b16 %v1210_v32, %v1209_v25  ;;  %v1389_v26 = vsel %vm1361_vm8, %v3335_v59, %v1099_v57 }
 0x16c   : > { %1207 = vrot.lane.b32.xlu2 %v2202_v2, %s2588_s8 }
 0x16d   : > { %1129 = vrot.lane.b32.xlu0 %v3036_v53, %s2587_s7  ;;  %v1422_v53 = vsel %vm1394_vm10, %v1389_v26, %v3545_v39 }
 0x16e   : > { %1199 = vrot.lane.b32.xlu1 %v3263_v56, %s2588_s8  ;;  %v1215_v8 = vpop.permute.xlu2 %1214  ;;  %v2083_v56 = vrot.slane %v3572_v49, 9  ;;  %v1455_v58 = vsel %vm1427_vm11, %v1422_v53, %v1169_v37 }
 0x16f   : > { %v1161_v40 = vpop.permute.xlu0 %1160 }
 0x170   : > { %v1231_v54 = vpop.permute.xlu1 %1230  ;;  %v857_v49 = vsel %vm2998_vm5, %v2083_v56, %v856_v10 }
 0x174   : > { %1269 = vrot.lane.b32.xlu2 %v3171_v47, %s2591_s11 }
 0x175   : > { %1172 = vrot.lane.b32.xlu0 %v3504_v14, %s2589_s9  ;;  %v1414_v14 = vsel %vm1394_vm10, %v3402_v48, %v1126_v43  ;;  %v1244_v48 = vunpack.c.l.b16 %v857_v49 }
 0x176   : > { %1242 = vrot.lane.b32.xlu1 %v1211_v0, %s2590_s10  ;;  %v1258_v30 = vpop.permute.xlu2 %1257  ;;  %v1447_v34 = vsel %vm1427_vm11, %v1414_v14, %v1161_v40 }
 0x177   : > { %v1204_v18 = vpop.permute.xlu0 %1203  ;;  %v1480_v28 = vsel %vm1460_vm13, %v1447_v34, %v3556_v15 }
 0x178   : > { %v1488_v59 = vsel %vm1460_vm13, %v1455_v58, %v1204_v18  ;;  %v1274_v4 = vpop.permute.xlu1 %1273  ;;  %v1513_v50 = vsel %vm1493_vm12, %v1480_v28, %v1231_v54 }
 0x179   : > { %v1521_v47 = vsel %vm1493_vm12, %v1488_v59, %v3567_v11  ;;  %v1245_v11 = vunpack.c.l.b16 %v860_v36  ;;  %v3709_v59 = vld [vmem:[%s3889_s2] ss:$0 sm:$0xff] }
 0x17a   : > { %v1554_v39 = vsel %vm1526_vm14, %v1521_v47, %v1274_v4 }
 0x17b   : > { %2177 = vmatmul.msk.bf16.gmra.mxu3 %vm1583_vm15, %v1554_v39 }
 0x17c   : > { %1121 = vrot.lane.b32.xlu2 %v3954_v45, %s2587_s7  ;;  %v1246_v45 = vpack.c.b16 %v1245_v11, %v1244_v48 }
 0x17d   : > { %1234 = vrot.lane.b32.xlu0 %v3007_v27, %s2590_s10 }
 0x17e   : > { %1113 = vrot.lane.b32.xlu1 %v3955_v62, %s2587_s7  ;;  %v1128_v43 = vpop.permute.xlu2 %1127  ;;  %v1398_v62 = vsel %vm1394_vm10, %v3435_v60, %v3598_v23  ;;  %s2205_s7 = sshll.u32 %s2574_s15, 7  ;;  %s1966_s15 = scalar_lea.sflag [#allocation3], %s175_s30 }
 0x17f   : > { %v1266_v6 = vpop.permute.xlu0 %1265 }
 0x180   : > { %v1546_v31 = vsel %vm1526_vm14, %v1513_v50, %v1266_v6  ;;  %v1145_v33 = vpop.permute.xlu1 %1144 }
 0x181   : > { %2173 = vmatmul.msk.bf16.gmra.mxu2 %vm1583_vm15, %v1546_v31 }
 0x184   : > { %1183 = vrot.lane.b32.xlu2 %v3238_v5, %s2588_s8  ;;  %v1431_v5 = vsel %vm1427_vm11, %v1398_v62, %v1145_v33 }
 0x185   : > { %1277 = vrot.lane.b32.xlu0 %v1246_v45, %s2591_s11 }
 0x186   : > { %1156 = vrot.lane.b32.xlu1 %v3174_v3, %s2589_s9  ;;  %v1171_v12 = vpop.permute.xlu2 %1170 }
 0x187   : > { %v1118_v27 = vpop.permute.xlu0 %1117 }
 0x188   : > { %v1188_v15 = vpop.permute.xlu1 %1187 }
 0x18c   : > { %1226 = vrot.lane.b32.xlu2 %v3941_v35, %s2590_s10 }
 0x18d   : > { %1148 = vrot.lane.b32.xlu0 %v3069_v61, %s2589_s9  ;;  %v1406_v61 = vsel %vm1394_vm10, %v3441_v55, %v1118_v27 }
 0x18e   : > { %1218 = vrot.lane.b32.xlu1 %v3945_v1, %s2590_s10  ;;  %v1439_v1 = vsel %vm1427_vm11, %v1406_v61, %v3610_v20  ;;  %v1233_v9 = vpop.permute.xlu2 %1232  ;;  %s1980_s10 = scalar_lea.hbm %s3890_s3, %s2205_s7 }
 0x18f   : > { %v1180_v13 = vpop.permute.xlu0 %1179  ;;  %v1472_v60 = vsel %vm1460_vm13, %v1439_v1, %v1188_v15  ;;  %s1983_s18 = sshll.u32 %s1980_s10, 4  ;;  %s1984_s18 = int_to_ptr.hbm [resolvable:$true] %s1983_s18 }
 0x190   : > { %v1464_v3 = vsel %vm1460_vm13, %v1431_v5, %v1180_v13  ;;  %v1250_v21 = vpop.permute.xlu1 %1249  ;;  %s2518_s19 = sshra.s32 %s1984_s18, 4  ;;  %s2519_s19 = int_to_ptr.hbm [resolvable:$true] %s2518_s19 }
 0x191   : > { %v1497_v52 = vsel %vm1493_vm12, %v1464_v3, %v1215_v8  ;;  %s2520_s21 = scalar_lea.hbm %s2519_s19, 128  ;;  %p2525_p1 = scmp.lt.s32.totalorder %s2519_s19, %s3890_s3 }
 0x192   : > { %v1530_v35 = vsel %vm1526_vm14, %v1497_v52, %v1250_v21  ;;  %p2521_p12 = scmp.ne.s32.totalorder %s2519_s19, %s2520_s21  ;;  %p2526_p2 = scmp.lt.s32.totalorder %s2524_s27, %s2520_s21 }
 0x193   : > { %2165 = vmatmul.msk.bf16.gmra.mxu0 %vm1583_vm15, %v1530_v35 }
 0x194   : > { %p2522_p13 = pnand %p2521_p12, %p2653_p4  ;;  %p2527_p3 = por %p2526_p2, %p2525_p1 }
 0x195   : > { %1191 = vrot.lane.b32.xlu0 %v3241_v19, %s2588_s8 }
 0x196   : > { %1261 = vrot.lane.b32.xlu1 %v3148_v63, %s2591_s11  ;;  %v1276_v20 = vpop.permute.xlu2 %1275  ;;  %p2523_p0 = pneg %p2522_p13 }
 0x197   : > { %v1223_v23 = vpop.permute.xlu0 %1222 }
 0x198   : > { %v1505_v57 = vsel %vm1493_vm12, %v1472_v60, %v1223_v23  ;;  %v1101_v41 = vpop.permute.xlu1 %1100  ;;  %p2528_p5 = pnand %p2527_p3, %p2523_p0 }
 0x199   : > { %v1538_v55 = vsel %vm1526_vm14, %v1505_v57, %v1258_v30 }
 0x19a   : > { %2169 = vmatmul.msk.bf16.gmra.mxu1 %vm1583_vm15, %v1538_v55 }
 0x19d   : > { %1253 = vrot.lane.b32.xlu0 %v3139_v29, %s2591_s11  ;;  %v1391_v29 = vsel %vm1361_vm8, %v3420_v46, %v1101_v41  ;;  %s1981_s11 = sshll.u32 %s3759_s6, 4  ;;  %s1982_s11 = int_to_ptr.vmem [resolvable:$true] %s1981_s11 }
 0x19e   : > { %v1147_v2 = vpop.permute.xlu2 %1146 }
 0x19f   : > { %v1093_v19 = vpop.permute.xlu0 %1092 }
 0x1a0   : > { %v1163_v7 = vpop.permute.xlu1 %1162  ;;  %v1383_v63 = vsel %vm1361_vm8, %v3319_v44, %v1093_v19 }
 0x1a1   : > { %v1416_v16 = vsel %vm1394_vm10, %v1383_v63, %v1128_v43 }
 0x1a2   : > { %v1449_v38 = vsel %vm1427_vm11, %v1416_v16, %v1163_v7 }
 0x1a6   : > { %v1190_v44 = vpop.permute.xlu2 %1189 }
 0x1a7   : > { %v1136_v22 = vpop.permute.xlu0 %1135 }
 0x1a8   : > { %v1206_v37 = vpop.permute.xlu1 %1205  ;;  %v1424_v0 = vsel %vm1394_vm10, %v1391_v29, %v1136_v22 }
 0x1a9   : > { %v1457_v10 = vsel %vm1427_vm11, %v1424_v0, %v1171_v12 }
 0x1aa   : > { %v1490_v26 = vsel %vm1460_vm13, %v1457_v10, %v1206_v37 }
 0x1ae   : > { %v1252_v58 = vpop.permute.xlu2 %1251 }
 0x1af   : > { %v1198_v25 = vpop.permute.xlu0 %1197 }
 0x1b0   : > { %v1482_v32 = vsel %vm1460_vm13, %v1449_v38, %v1198_v25  ;;  %v1268_v40 = vpop.permute.xlu1 %1267 }
 0x1b1   : > { %v1515_v8 = vsel %vm1493_vm12, %v1482_v32, %v1233_v9 }
 0x1b2   : > { %v1548_v54 = vsel %vm1526_vm14, %v1515_v8, %v1268_v40 }
 0x1b3   : > { %2174 = vmatmul.msk.bf16.gmra.mxu2 %vm1583_vm15, %v1548_v54 }
 0x1b6   : > { %v3715_v49 = vpop.permute.xlu2 %1102 }
 0x1b7   : > { %v1241_v53 = vpop.permute.xlu0 %1240 }
 0x1b8   : > { %v1523_v56 = vsel %vm1493_vm12, %v1490_v26, %v1241_v53  ;;  %v1120_v42 = vpop.permute.xlu1 %1119 }
 0x1b9   : > { %v1556_v24 = vsel %vm1526_vm14, %v1523_v56, %v1276_v20  ;;  %v1408_v12 = vsel %vm1394_vm10, %v3385_v51, %v1120_v42 }
 0x1ba   : > { %2178 = vmatmul.msk.bf16.gmra.mxu3 %vm1583_vm15, %v1556_v24 }
 0x1be   : > { %v3734_v3 = vpop.permute.xlu2 %1164 }
 0x1bf   : > { %v1112_v46 = vpop.permute.xlu0 %1111 }
 0x1c0   : > { %v1182_v18 = vpop.permute.xlu1 %1181  ;;  %v1400_v36 = vsel %vm1394_vm10, %v3423_v17, %v1112_v46 }
 0x1c1   : > { %v1433_v28 = vsel %vm1427_vm11, %v1400_v36, %v1147_v2 }
 0x1c2   : > { %v1466_v6 = vsel %vm1460_vm13, %v1433_v28, %v1182_v18  ;;  %v3956_v28 = vld [vmem:[#allocation14_spill] sm:$0xff] }
 0x1c6   : > { %v1689_v4 = vpop.f32.mrf.mxu3  ;;  %v3747_v16 = vpop.permute.xlu2 %1207 }
 0x1c7   : > { %v1155_v47 = vpop.permute.xlu0 %1154  ;;  %v3712_v14 = vadd.f32 %v3709_v59, %v1689_v4 }
 0x1c8   : > { %v1225_v30 = vpop.permute.xlu1 %1224  ;;  %v1441_v5 = vsel %vm1427_vm11, %v1408_v12, %v1155_v47 }
 0x1c9   : > { %v1733_v39 = vsub.f32 0.0, %v3712_v14  ;;  %v1474_v61 = vsel %vm1460_vm13, %v1441_v5, %v1190_v44 }
 0x1ca   : > { %v1507_v1 = vsel %vm1493_vm12, %v1474_v61, %v1225_v30 }
 0x1cb   : > { %v1789_v34 = vmul.f32 1.442695, %v1733_v39 }
 0x1cc   : > { %v1669_v48 = vpop.f32.mrf.mxu2 }
 0x1cd   : > { %v3720_v11 = vadd.f32 %v3709_v59, %v1669_v48  ;;  %2376 = vpow2.f32 %v1789_v34 }
 0x1ce   : > { %v1691_v50 = vpop.f32.mrf.mxu3 }
 0x1cf   : > { %v1725_v31 = vsub.f32 0.0, %v3720_v11  ;;  %v1217_v33 = vpop.permute.xlu0 %1216  ;;  %v1692_v45 = vadd.f32 %v3709_v59, %v1691_v50 }
 0x1d0   : > { %v1499_v43 = vsel %vm1493_vm12, %v1466_v6, %v1217_v33  ;;  %v3727_v27 = vpop.permute.xlu1 %1094 }
 0x1d1   : > { %v1773_v17 = vmul.f32 1.442695, %v1725_v31  ;;  %v1532_v15 = vsel %vm1526_vm14, %v1499_v43, %v1252_v58  ;;  %v1734_v62 = vsub.f32 0.0, %v1692_v45  ;;  %v1385_v50 = vsel %vm1361_vm8, %v3956_v28, %v3727_v27 }
 0x1d2   : > { %2166 = vmatmul.msk.bf16.gmra.mxu0 %vm1583_vm15, %v1532_v15 }
 0x1d3   : > { %v1791_v13 = vmul.f32 1.442695, %v1734_v62  ;;  %2378 = vpow2.f32 %v1773_v17  ;;  %v2377_v52 = vpop.eup %2376 }
 0x1d4   : > { %v1671_v21 = vpop.f32.mrf.mxu2  ;;  %v1829_v51 = vadd.f32 1.0, %v2377_v52  ;;  %v3957_v52 = vld [vmem:[#allocation16_spill] sm:$0xff] }
 0x1d5   : > { %v1672_v35 = vadd.f32 %v3709_v59, %v1671_v21  ;;  %2380 = vpow2.f32 %v1791_v13 }
 0x1d7   : > { %v1726_v60 = vsub.f32 0.0, %v1672_v35  ;;  %v1260_v23 = vpop.permute.xlu0 %1259 }
 0x1d8   : > { %v1540_v9 = vsel %vm1526_vm14, %v1507_v1, %v1260_v23  ;;  %v1629_v57 = vpop.f32.mrf.mxu0  ;;  %v3740_v41 = vpop.permute.xlu1 %1137 }
 0x1d9   : > { %v1775_v55 = vmul.f32 1.442695, %v1726_v60  ;;  %2170 = vmatmul.msk.bf16.gmra.mxu1 %vm1583_vm15, %v1540_v9  ;;  %v3744_v19 = vadd.f32 %v3709_v59, %v1629_v57  ;;  %v2379_v7 = vpop.eup %2378 }
 0x1da   : > { %v1821_v2 = vadd.f32 1.0, %v2379_v7 }
 0x1db   : > { %v2381_v20 = vpop.eup %2380  ;;  %2382 = vpow2.f32 %v1775_v55  ;;  %v1709_v22 = vsub.f32 0.0, %v3744_v19 }
 0x1dc   : > { %2384 = vrcp.f32 %v1829_v51  ;;  %v1830_v37 = vadd.f32 1.0, %v2381_v20 }
 0x1dd   : > { %v1741_v63 = vmul.f32 1.442695, %v1709_v22 }
 0x1de   : > { %2386 = vrcp.f32 %v1830_v37 }
 0x1df   : > { %v1649_v38 = vpop.f32.mrf.mxu1  ;;  %v1130_v25 = vpop.permute.xlu0 %1129  ;;  %2388 = vpow2.f32 %v1741_v63 }
 0x1e0   : > { %v3751_v32 = vadd.f32 %v3709_v59, %v1649_v38  ;;  %v1631_v40 = vpop.f32.mrf.mxu0  ;;  %v1200_v8 = vpop.permute.xlu1 %1199  ;;  %2390 = vrcp.f32 %v1821_v2 }
 0x1e1   : > { %v2383_v29 = vpop.eup %2382  ;;  %v1632_v54 = vadd.f32 %v3709_v59, %v1631_v40 }
 0x1e2   : > { %v2385_v0 = vpop.eup %2384  ;;  %v1822_v44 = vadd.f32 1.0, %v2383_v29  ;;  %v1717_v10 = vsub.f32 0.0, %v3751_v32 }
 0x1e3   : > { %v1710_v26 = vsub.f32 0.0, %v1632_v54  ;;  %v1893_v42 = vmul.f32 %v2385_v0, %v3712_v14  ;;  %v1270_v14 = vpop.permute.xlu2 %1269 }
 0x1e4   : > { %v2387_v53 = vpop.eup %2386  ;;  %2392 = vrcp.f32 %v1822_v44  ;;  %v1757_v56 = vmul.f32 1.442695, %v1717_v10 }
 0x1e5   : > { %v1894_v24 = vmul.f32 %v2387_v53, %v1692_v45  ;;  %v1743_v46 = vmul.f32 1.442695, %v1710_v26  ;;  %v2389_v58 = vpop.eup %2388  ;;  %v1418_v45 = vsel %vm1394_vm10, %v1385_v50, %v1130_v25 }
 0x1e6   : > { %v2391_v30 = vpop.eup %2390  ;;  %v1805_v34 = vadd.f32 1.0, %v2389_v58  ;;  %v1451_v5 = vsel %vm1427_vm11, %v1418_v45, %v3734_v3 }
 0x1e7   : > { %v2269_v18 = vpack.c.bf16 %v1894_v24, %v1893_v42  ;;  %2394 = vpow2.f32 %v1743_v46  ;;  %v1651_v4 = vpop.f32.mrf.mxu1  ;;  %v1173_v47 = vpop.permute.xlu0 %1172  ;;  %v1885_v31 = vmul.f32 %v2391_v30, %v3720_v11  ;;  %v1484_v13 = vsel %vm1460_vm13, %v1451_v5, %v1200_v8  ;;  %v3958_v42 = vld [vmem:[#allocation17_spill] sm:$0xff] }
 0x1e8   : > { %2396 = vpow2.f32 %v1757_v56  ;;  %v1652_v39 = vadd.f32 %v3709_v59, %v1651_v4  ;;  %v1243_v36 = vpop.permute.xlu1 %1242 }
 0x1e9   : > { %2297 = vst [vmem:[%s3759_s6 + $0x60] sm:$0xff] %v2269_v18   ;;  %2398 = vrcp.f32 %v1805_v34 }
 0x1ea   : > { %v2393_v48 = vpop.eup %2392  ;;  %v1718_v6 = vsub.f32 0.0, %v1652_v39 }
 0x1eb   : > { %v1886_v33 = vmul.f32 %v2393_v48, %v1672_v35  ;;  %v1393_v35 = vsel %vm1361_vm8, %v3957_v52, %v3715_v49  ;;  %v1122_v9 = vpop.permute.xlu2 %1121 }
 0x1ec   : > { %v1759_v43 = vmul.f32 1.442695, %v1718_v6  ;;  %v1426_v60 = vsel %vm1394_vm10, %v1393_v35, %v3740_v41  ;;  %v1410_v24 = vsel %vm1394_vm10, %v3958_v42, %v1122_v9 }
 0x1ed   : > { %v2395_v17 = vpop.eup %2394  ;;  %v2249_v15 = vpack.c.bf16 %v1886_v33, %v1885_v31  ;;  %v1459_v23 = vsel %vm1427_vm11, %v1426_v60, %v1173_v47 }
 0x1ee   : > { %v2397_v62 = vpop.eup %2396  ;;  %v1806_v12 = vadd.f32 1.0, %v2395_v17  ;;  %2400 = vpow2.f32 %v1759_v43  ;;  %v1492_v49 = vsel %vm1460_vm13, %v1459_v23, %v3747_v16 }
 0x1ef   : > { %2293 = vst [vmem:[%s3759_s6 + $0x40] sm:$0xff] %v2249_v15   ;;  %v1235_v27 = vpop.permute.xlu0 %1234  ;;  %v1813_v61 = vadd.f32 1.0, %v2397_v62  ;;  %v2399_v3 = vpop.eup %2398  ;;  %v1525_v41 = vsel %vm1493_vm12, %v1492_v49, %v1243_v36 }
 0x1f0   : > { %2402 = vrcp.f32 %v1806_v12  ;;  %v1517_v11 = vsel %vm1493_vm12, %v1484_v13, %v1235_v27  ;;  %v1114_v21 = vpop.permute.xlu1 %1113  ;;  %v1869_v7 = vmul.f32 %v2399_v3, %v3744_v19 }
 0x1f1   : > { %v1550_v1 = vsel %vm1526_vm14, %v1517_v11, %v1270_v14  ;;  %2404 = vrcp.f32 %v1813_v61  ;;  %v3959_v14 = vld [vmem:[#allocation11_spill] sm:$0xff] }
 0x1f2   : > { %2175 = vmatmul.msk.bf16.gmra.mxu2 %vm1583_vm15, %v1550_v1  ;;  %v1402_v28 = vsel %vm1394_vm10, %v3959_v14, %v1114_v21 }
 0x1f3   : > { %v1184_v25 = vpop.permute.xlu2 %1183 }
 0x1f4   : > { %v2401_v51 = vpop.eup %2400 }
 0x1f5   : > { %v1814_v57 = vadd.f32 1.0, %v2401_v51 }
 0x1f6   : > { %v2403_v55 = vpop.eup %2402 }
 0x1f7   : > { %v1870_v20 = vmul.f32 %v2403_v55, %v1632_v54  ;;  %2406 = vrcp.f32 %v1814_v57  ;;  %v1278_v22 = vpop.permute.xlu0 %1277  ;;  %v2405_v38 = vpop.eup %2404 }
 0x1f8   : > { %v1558_v37 = vsel %vm1526_vm14, %v1525_v41, %v1278_v22  ;;  %v1157_v63 = vpop.permute.xlu1 %1156  ;;  %v1877_v16 = vmul.f32 %v2405_v38, %v3751_v32 }
 0x1f9   : > { %v2209_v2 = vpack.c.bf16 %v1870_v20, %v1869_v7  ;;  %2179 = vmatmul.msk.bf16.gmra.mxu3 %vm1583_vm15, %v1558_v37  ;;  %v1443_v58 = vsel %vm1427_vm11, %v1410_v24, %v1157_v63 }
 0x1fb   : > { %2210 = vst [vmem:[%s3759_s6] sm:$0xff] %v2209_v2   ;;  %v1227_v32 = vpop.permute.xlu2 %1226 }
 0x1fd   : > { %v2407_v40 = vpop.eup %2406 }
 0x1fe   : > { %v1878_v8 = vmul.f32 %v2407_v40, %v1652_v39  ;;  %v1694_v19 = vpop.f32.mrf.mxu3 }
 0x1ff   : > { %v1149_v29 = vpop.permute.xlu0 %1148  ;;  %v3789_v54 = vadd.f32 %v3709_v59, %v1694_v19 }
 0x200   : > { %v2229_v0 = vpack.c.bf16 %v1878_v8, %v1877_v16  ;;  %v1219_v44 = vpop.permute.xlu1 %1218  ;;  %v1435_v6 = vsel %vm1427_vm11, %v1402_v28, %v1149_v29 }
 0x201   : > { %v1735_v10 = vsub.f32 0.0, %v3789_v54  ;;  %v1468_v17 = vsel %vm1460_vm13, %v1435_v6, %v1184_v25 }
 0x202   : > { %2289 = vst [vmem:[%s3759_s6 + $0x20] sm:$0xff] %v2229_v0   ;;  %v1501_v15 = vsel %vm1493_vm12, %v1468_v17, %v1219_v44 }
 0x203   : > { %v1793_v26 = vmul.f32 1.442695, %v1735_v10 }
 0x204   : > { %v1674_v53 = vpop.f32.mrf.mxu2 }
 0x205   : > { %v3794_v56 = vadd.f32 %v3709_v59, %v1674_v53  ;;  %2408 = vpow2.f32 %v1793_v26 }
 0x206   : > { %v1696_v46 = vpop.f32.mrf.mxu3 }
 0x207   : > { %v1727_v18 = vsub.f32 0.0, %v3794_v56  ;;  %v1192_v4 = vpop.permute.xlu0 %1191  ;;  %v1697_v47 = vadd.f32 %v3709_v59, %v1696_v46 }
 0x208   : > { %v1476_v30 = vsel %vm1460_vm13, %v1443_v58, %v1192_v4  ;;  %v1262_v39 = vpop.permute.xlu1 %1261 }
 0x209   : > { %v1777_v36 = vmul.f32 1.442695, %v1727_v18  ;;  %v1509_v34 = vsel %vm1493_vm12, %v1476_v30, %v1227_v32  ;;  %v1736_v48 = vsub.f32 0.0, %v1697_v47 }
 0x20a   : > { %v1542_v50 = vsel %vm1526_vm14, %v1509_v34, %v1262_v39 }
 0x20b   : > { %v1795_v31 = vmul.f32 1.442695, %v1736_v48  ;;  %2171 = vmatmul.msk.bf16.gmra.mxu1 %vm1583_vm15, %v1542_v50  ;;  %2410 = vpow2.f32 %v1777_v36  ;;  %v2409_v45 = vpop.eup %2408 }
 0x20c   : > { %v1676_v33 = vpop.f32.mrf.mxu2  ;;  %v1831_v5 = vadd.f32 1.0, %v2409_v45 }
 0x20d   : > { %v1677_v43 = vadd.f32 %v3709_v59, %v1676_v33  ;;  %2412 = vpow2.f32 %v1795_v31 }
 0x20f   : > { %v1728_v62 = vsub.f32 0.0, %v1677_v43  ;;  %v1254_v12 = vpop.permute.xlu0 %1253 }
 0x210   : > { %v1534_v13 = vsel %vm1526_vm14, %v1501_v15, %v1254_v12  ;;  %v1634_v27 = vpop.f32.mrf.mxu0 }
 0x211   : > { %v1779_v11 = vmul.f32 1.442695, %v1728_v62  ;;  %2167 = vmatmul.msk.bf16.gmra.mxu0 %vm1583_vm15, %v1534_v13  ;;  %v1635_v21 = vadd.f32 %v3709_v59, %v1634_v27  ;;  %v2411_v52 = vpop.eup %2410 }
 0x212   : > { %v1823_v3 = vadd.f32 1.0, %v2411_v52 }
 0x213   : > { %v2413_v35 = vpop.eup %2412  ;;  %2414 = vpow2.f32 %v1779_v11  ;;  %v1711_v61 = vsub.f32 0.0, %v1635_v21 }
 0x214   : > { %2416 = vrcp.f32 %v1831_v5  ;;  %v1832_v1 = vadd.f32 1.0, %v2413_v35 }
 0x215   : > { %v1745_v60 = vmul.f32 1.442695, %v1711_v61 }
 0x216   : > { %2418 = vrcp.f32 %v1832_v1 }
 0x217   : > { %v1654_v23 = vpop.f32.mrf.mxu1  ;;  %2420 = vpow2.f32 %v1745_v60 }
 0x218   : > { %v1655_v51 = vadd.f32 %v3709_v59, %v1654_v23  ;;  %v1636_v9 = vpop.f32.mrf.mxu0  ;;  %2422 = vrcp.f32 %v1823_v3 }
 0x219   : > { %v2415_v57 = vpop.eup %2414  ;;  %v1637_v55 = vadd.f32 %v3709_v59, %v1636_v9 }
 0x21a   : > { %v2417_v49 = vpop.eup %2416  ;;  %v1824_v7 = vadd.f32 1.0, %v2415_v57  ;;  %v1719_v20 = vsub.f32 0.0, %v1655_v51 }
 0x21b   : > { %v1712_v41 = vsub.f32 0.0, %v1637_v55  ;;  %v1895_v63 = vmul.f32 %v2417_v49, %v3789_v54 }
 0x21c   : > { %v2419_v22 = vpop.eup %2418  ;;  %2424 = vrcp.f32 %v1824_v7  ;;  %v1761_v37 = vmul.f32 1.442695, %v1719_v20 }
 0x21d   : > { %v1896_v2 = vmul.f32 %v2419_v22, %v1697_v47  ;;  %v1747_v38 = vmul.f32 1.442695, %v1712_v41  ;;  %v2421_v25 = vpop.eup %2420 }
 0x21e   : > { %v2423_v8 = vpop.eup %2422  ;;  %v1807_v29 = vadd.f32 1.0, %v2421_v25 }
 0x21f   : > { %v2274_v40 = vpack.c.bf16 %v1896_v2, %v1895_v63  ;;  %2426 = vpow2.f32 %v1747_v38  ;;  %v1656_v16 = vpop.f32.mrf.mxu1  ;;  %v1887_v10 = vmul.f32 %v2423_v8, %v3794_v56 }
 0x220   : > { %2428 = vpow2.f32 %v1761_v37  ;;  %v1657_v19 = vadd.f32 %v3709_v59, %v1656_v16 }
 0x221   : > { %2298 = vst [vmem:[%s3759_s6 + $0x68] sm:$0xff] %v2274_v40   ;;  %2430 = vrcp.f32 %v1807_v29 }
 0x222   : > { %v2425_v0 = vpop.eup %2424  ;;  %v1720_v44 = vsub.f32 0.0, %v1657_v19 }
 0x223   : > { %v1888_v26 = vmul.f32 %v2425_v0, %v1677_v43 }
 0x224   : > { %v1763_v53 = vmul.f32 1.442695, %v1720_v44 }
 0x225   : > { %v2427_v54 = vpop.eup %2426  ;;  %v2254_v42 = vpack.c.bf16 %v1888_v26, %v1887_v10 }
 0x226   : > { %v2429_v24 = vpop.eup %2428  ;;  %v1808_v32 = vadd.f32 1.0, %v2427_v54  ;;  %2432 = vpow2.f32 %v1763_v53 }
 0x227   : > { %2294 = vst [vmem:[%s3759_s6 + $0x48] sm:$0xff] %v2254_v42   ;;  %v1815_v46 = vadd.f32 1.0, %v2429_v24  ;;  %v2431_v58 = vpop.eup %2430 }
 0x228   : > { %2434 = vrcp.f32 %v1808_v32  ;;  %v1871_v30 = vmul.f32 %v2431_v58, %v1635_v21 }
 0x229   : > { %2436 = vrcp.f32 %v1815_v46 }
 0x22c   : > { %v2433_v18 = vpop.eup %2432 }
 0x22d   : > { %v1816_v4 = vadd.f32 1.0, %v2433_v18 }
 0x22e   : > { %v2435_v47 = vpop.eup %2434 }
 0x22f   : > { %v1872_v56 = vmul.f32 %v2435_v47, %v1637_v55  ;;  %2438 = vrcp.f32 %v1816_v4  ;;  %v2437_v36 = vpop.eup %2436 }
 0x230   : > { %v1879_v48 = vmul.f32 %v2437_v36, %v1655_v51 }
 0x231   : > { %v2214_v39 = vpack.c.bf16 %v1872_v56, %v1871_v30 }
 0x233   : > { %2286 = vst [vmem:[%s3759_s6 + $0x8] sm:$0xff] %v2214_v39  }
 0x235   : > { %v2439_v34 = vpop.eup %2438 }
 0x236   : > { %v1880_v14 = vmul.f32 %v2439_v34, %v1657_v19  ;;  %v1679_v28 = vpop.f32.mrf.mxu2 }
 0x237   : > { %v1680_v50 = vadd.f32 %v3709_v59, %v1679_v28 }
 0x238   : > { %v2234_v6 = vpack.c.bf16 %v1880_v14, %v1879_v48 }
 0x239   : > { %v1729_v31 = vsub.f32 0.0, %v1680_v50 }
 0x23a   : > { %2290 = vst [vmem:[%s3759_s6 + $0x28] sm:$0xff] %v2234_v6  }
 0x23b   : > { %v1781_v33 = vmul.f32 1.442695, %v1729_v31 }
 0x23d   : > { %v1699_v45 = vpop.f32.mrf.mxu3  ;;  %2440 = vpow2.f32 %v1781_v33 }
 0x23e   : > { %v1700_v43 = vadd.f32 %v3709_v59, %v1699_v45  ;;  %v1681_v17 = vpop.f32.mrf.mxu2 }
 0x23f   : > { %v1682_v15 = vadd.f32 %v3709_v59, %v1681_v17 }
 0x240   : > { %v1737_v62 = vsub.f32 0.0, %v1700_v43 }
 0x241   : > { %v1730_v12 = vsub.f32 0.0, %v1682_v15 }
 0x242   : > { %v1797_v5 = vmul.f32 1.442695, %v1737_v62 }
 0x243   : > { %v1783_v13 = vmul.f32 1.442695, %v1730_v12  ;;  %v2441_v27 = vpop.eup %2440 }
 0x244   : > { %v1825_v52 = vadd.f32 1.0, %v2441_v27 }
 0x245   : > { %2442 = vpow2.f32 %v1783_v13  ;;  %v1701_v11 = vpop.f32.mrf.mxu3 }
 0x246   : > { %2444 = vpow2.f32 %v1797_v5  ;;  %v1702_v21 = vadd.f32 %v3709_v59, %v1701_v11 }
 0x247   : > { %2446 = vrcp.f32 %v1825_v52 }
 0x248   : > { %v1738_v35 = vsub.f32 0.0, %v1702_v21 }
 0x24a   : > { %v1799_v61 = vmul.f32 1.442695, %v1738_v35 }
 0x24b   : > { %v2443_v1 = vpop.eup %2442 }
 0x24c   : > { %v2445_v60 = vpop.eup %2444  ;;  %v1826_v3 = vadd.f32 1.0, %v2443_v1  ;;  %2448 = vpow2.f32 %v1799_v61 }
 0x24d   : > { %v1833_v23 = vadd.f32 1.0, %v2445_v60  ;;  %v2447_v57 = vpop.eup %2446 }
 0x24e   : > { %2450 = vrcp.f32 %v1826_v3  ;;  %v1889_v22 = vmul.f32 %v2447_v57, %v1680_v50 }
 0x24f   : > { %v1639_v51 = vpop.f32.mrf.mxu0  ;;  %2452 = vrcp.f32 %v1833_v23 }
 0x250   : > { %v1640_v9 = vadd.f32 %v3709_v59, %v1639_v51 }
 0x252   : > { %v2449_v55 = vpop.eup %2448  ;;  %v1713_v49 = vsub.f32 0.0, %v1640_v9 }
 0x253   : > { %v1834_v7 = vadd.f32 1.0, %v2449_v55 }
 0x254   : > { %v2451_v20 = vpop.eup %2450  ;;  %v1749_v41 = vmul.f32 1.442695, %v1713_v49 }
 0x255   : > { %v1890_v37 = vmul.f32 %v2451_v20, %v1682_v15  ;;  %2454 = vrcp.f32 %v1834_v7  ;;  %v2453_v16 = vpop.eup %2452 }
 0x256   : > { %v1659_v63 = vpop.f32.mrf.mxu1  ;;  %2456 = vpow2.f32 %v1749_v41  ;;  %v1897_v44 = vmul.f32 %v2453_v16, %v1700_v43 }
 0x257   : > { %v2259_v2 = vpack.c.bf16 %v1890_v37, %v1889_v22  ;;  %v1660_v38 = vadd.f32 %v3709_v59, %v1659_v63  ;;  %v1641_v25 = vpop.f32.mrf.mxu0 }
 0x258   : > { %v1642_v40 = vadd.f32 %v3709_v59, %v1641_v25 }
 0x259   : > { %2295 = vst [vmem:[%s3759_s6 + $0x50] sm:$0xff] %v2259_v2   ;;  %v1721_v8 = vsub.f32 0.0, %v1660_v38 }
 0x25a   : > { %v1714_v19 = vsub.f32 0.0, %v1642_v40 }
 0x25b   : > { %v2455_v29 = vpop.eup %2454  ;;  %v1765_v0 = vmul.f32 1.442695, %v1721_v8 }
 0x25c   : > { %v1898_v10 = vmul.f32 %v2455_v29, %v1702_v21  ;;  %v1751_v26 = vmul.f32 1.442695, %v1714_v19  ;;  %v2457_v53 = vpop.eup %2456 }
 0x25d   : > { %v1809_v32 = vadd.f32 1.0, %v2457_v53 }
 0x25e   : > { %v2279_v54 = vpack.c.bf16 %v1898_v10, %v1897_v44  ;;  %2458 = vpow2.f32 %v1751_v26  ;;  %v1661_v42 = vpop.f32.mrf.mxu1 }
 0x25f   : > { %2460 = vpow2.f32 %v1765_v0  ;;  %v1662_v24 = vadd.f32 %v3709_v59, %v1661_v42 }
 0x260   : > { %2299 = vst [vmem:[%s3759_s6 + $0x70] sm:$0xff] %v2279_v54   ;;  %2462 = vrcp.f32 %v1809_v32 }
 0x261   : > { %v1722_v46 = vsub.f32 0.0, %v1662_v24 }
 0x263   : > { %v1767_v58 = vmul.f32 1.442695, %v1722_v46 }
 0x264   : > { %v2459_v18 = vpop.eup %2458 }
 0x265   : > { %v2461_v4 = vpop.eup %2460  ;;  %v1810_v47 = vadd.f32 1.0, %v2459_v18  ;;  %2464 = vpow2.f32 %v1767_v58 }
 0x266   : > { %v1817_v30 = vadd.f32 1.0, %v2461_v4  ;;  %v2463_v56 = vpop.eup %2462 }
 0x267   : > { %2466 = vrcp.f32 %v1810_v47  ;;  %v1873_v48 = vmul.f32 %v2463_v56, %v1640_v9 }
 0x268   : > { %2468 = vrcp.f32 %v1817_v30 }
 0x26b   : > { %v2465_v39 = vpop.eup %2464 }
 0x26c   : > { %v1818_v36 = vadd.f32 1.0, %v2465_v39 }
 0x26d   : > { %v2467_v34 = vpop.eup %2466 }
 0x26e   : > { %v1874_v14 = vmul.f32 %v2467_v34, %v1642_v40  ;;  %2470 = vrcp.f32 %v1818_v36  ;;  %v2469_v50 = vpop.eup %2468 }
 0x26f   : > { %v1881_v31 = vmul.f32 %v2469_v50, %v1660_v38 }
 0x270   : > { %v2219_v28 = vpack.c.bf16 %v1874_v14, %v1873_v48 }
 0x272   : > { %2287 = vst [vmem:[%s3759_s6 + $0x10] sm:$0xff] %v2219_v28  }
 0x274   : > { %v2471_v6 = vpop.eup %2470 }
 0x275   : > { %v1882_v33 = vmul.f32 %v2471_v6, %v1662_v24  ;;  %v1684_v45 = vpop.f32.mrf.mxu2 }
 0x276   : > { %v1685_v43 = vadd.f32 %v3709_v59, %v1684_v45 }
 0x277   : > { %v2239_v17 = vpack.c.bf16 %v1882_v33, %v1881_v31 }
 0x278   : > { %v1731_v15 = vsub.f32 0.0, %v1685_v43 }
 0x279   : > { %2291 = vst [vmem:[%s3759_s6 + $0x30] sm:$0xff] %v2239_v17  }
 0x27a   : > { %v1785_v62 = vmul.f32 1.442695, %v1731_v15 }
 0x27c   : > { %v1704_v12 = vpop.f32.mrf.mxu3  ;;  %2472 = vpow2.f32 %v1785_v62 }
 0x27d   : > { %v1705_v5 = vadd.f32 %v3709_v59, %v1704_v12  ;;  %v1686_v13 = vpop.f32.mrf.mxu2 }
 0x27e   : > { %v1687_v27 = vadd.f32 %v3709_v59, %v1686_v13 }
 0x27f   : > { %v1739_v11 = vsub.f32 0.0, %v1705_v5 }
 0x280   : > { %v1732_v21 = vsub.f32 0.0, %v1687_v27 }
 0x281   : > { %v1801_v52 = vmul.f32 1.442695, %v1739_v11 }
 0x282   : > { %v1787_v35 = vmul.f32 1.442695, %v1732_v21  ;;  %v2473_v61 = vpop.eup %2472 }
 0x283   : > { %v1827_v3 = vadd.f32 1.0, %v2473_v61 }
 0x284   : > { %2474 = vpow2.f32 %v1787_v35  ;;  %v1706_v1 = vpop.f32.mrf.mxu3 }
 0x285   : > { %2476 = vpow2.f32 %v1801_v52  ;;  %v1707_v60 = vadd.f32 %v3709_v59, %v1706_v1 }
 0x286   : > { %2478 = vrcp.f32 %v1827_v3 }
 0x287   : > { %v1740_v23 = vsub.f32 0.0, %v1707_v60 }
 0x288   : > { %v1664_v51 = vpop.f32.mrf.mxu1 }
 0x289   : > { %v1803_v9 = vmul.f32 1.442695, %v1740_v23  ;;  %v1665_v57 = vadd.f32 %v3709_v59, %v1664_v51 }
 0x28a   : > { %v2475_v55 = vpop.eup %2474 }
 0x28b   : > { %v2477_v49 = vpop.eup %2476  ;;  %v1828_v7 = vadd.f32 1.0, %v2475_v55  ;;  %2480 = vpow2.f32 %v1803_v9  ;;  %v1723_v20 = vsub.f32 0.0, %v1665_v57 }
 0x28c   : > { %v1835_v22 = vadd.f32 1.0, %v2477_v49  ;;  %v2479_v2 = vpop.eup %2478 }
 0x28d   : > { %2482 = vrcp.f32 %v1828_v7  ;;  %v1769_v41 = vmul.f32 1.442695, %v1723_v20  ;;  %v1891_v44 = vmul.f32 %v2479_v2, %v1685_v43 }
 0x28e   : > { %v1644_v37 = vpop.f32.mrf.mxu0 }
 0x28f   : > { %v1645_v63 = vadd.f32 %v3709_v59, %v1644_v37  ;;  %2484 = vpow2.f32 %v1769_v41 }
 0x290   : > { %v1666_v38 = vpop.f32.mrf.mxu1  ;;  %2486 = vrcp.f32 %v1835_v22 }
 0x291   : > { %v2481_v25 = vpop.eup %2480  ;;  %v1715_v40 = vsub.f32 0.0, %v1645_v63  ;;  %v1667_v16 = vadd.f32 %v3709_v59, %v1666_v38 }
 0x292   : > { %v1836_v8 = vadd.f32 1.0, %v2481_v25 }
 0x293   : > { %v2483_v19 = vpop.eup %2482  ;;  %v1753_v29 = vmul.f32 1.442695, %v1715_v40  ;;  %v1724_v0 = vsub.f32 0.0, %v1667_v16 }
 0x294   : > { %v1892_v10 = vmul.f32 %v2483_v19, %v1687_v27  ;;  %2488 = vrcp.f32 %v1836_v8 }
 0x295   : > { %v1771_v26 = vmul.f32 1.442695, %v1724_v0  ;;  %2490 = vpow2.f32 %v1753_v29  ;;  %v2485_v42 = vpop.eup %2484 }
 0x296   : > { %v2264_v53 = vpack.c.bf16 %v1892_v10, %v1891_v44  ;;  %v1646_v54 = vpop.f32.mrf.mxu0  ;;  %v2487_v32 = vpop.eup %2486  ;;  %v1819_v18 = vadd.f32 1.0, %v2485_v42 }
 0x297   : > { %v1647_v24 = vadd.f32 %v3709_v59, %v1646_v54  ;;  %2492 = vpow2.f32 %v1771_v26  ;;  %v1899_v4 = vmul.f32 %v2487_v32, %v1705_v5 }
 0x298   : > { %2296 = vst [vmem:[%s3759_s6 + $0x58] sm:$0xff] %v2264_v53  }
 0x299   : > { %v1716_v46 = vsub.f32 0.0, %v1647_v24 }
 0x29a   : > { %v2489_v58 = vpop.eup %2488 }
 0x29b   : > { %v1900_v47 = vmul.f32 %v2489_v58, %v1707_v60  ;;  %v1755_v30 = vmul.f32 1.442695, %v1716_v46  ;;  %v2491_v56 = vpop.eup %2490 }
 0x29c   : > { %v1811_v59 = vadd.f32 1.0, %v2491_v56 }
 0x29d   : > { %v2493_v39 = vpop.eup %2492  ;;  %v2284_v36 = vpack.c.bf16 %v1900_v47, %v1899_v4  ;;  %2494 = vpow2.f32 %v1755_v30 }
 0x29e   : > { %2496 = vrcp.f32 %v1819_v18  ;;  %v1820_v34 = vadd.f32 1.0, %v2493_v39 }
 0x29f   : > { %2300 = vst [vmem:[%s3759_s6 + $0x78] sm:$0xff] %v2284_v36  }
 0x2a0   : > { %2498 = vrcp.f32 %v1820_v34 }
 0x2a1   : > { %2500 = vrcp.f32 %v1811_v59 }
 0x2a3   : > { %v2495_v48 = vpop.eup %2494 }
 0x2a4   : > { %v2497_v14 = vpop.eup %2496  ;;  %v1812_v28 = vadd.f32 1.0, %v2495_v48 }
 0x2a5   : > { %v1883_v6 = vmul.f32 %v2497_v14, %v1665_v57 }
 0x2a6   : > { %v2499_v50 = vpop.eup %2498  ;;  %2502 = vrcp.f32 %v1812_v28 }
 0x2a7   : > { %v1884_v31 = vmul.f32 %v2499_v50, %v1667_v16  ;;  %v2501_v45 = vpop.eup %2500 }
 0x2a8   : > { %v1875_v17 = vmul.f32 %v2501_v45, %v1645_v63 }
 0x2a9   : > { %v2244_v33 = vpack.c.bf16 %v1884_v31, %v1883_v6 }
 0x2ab   : > { %2292 = vst [vmem:[%s3759_s6 + $0x38] sm:$0xff] %v2244_v33  }
 0x2ac   : > { %v2503_v43 = vpop.eup %2502 }
 0x2ad   : > { %v1876_v15 = vmul.f32 %v2503_v43, %v1647_v24 }
 0x2af   : > { %v2224_v62 = vpack.c.bf16 %v1876_v15, %v1875_v17 }
 0x2b1   : > { %2288 = vst [vmem:[%s3759_s6 + $0x18] sm:$0xff] %v2224_v62  }
 0x2b2   : > { %2531 = shalt.err (!%p2528_p5)
}
 0x2b3   : > { %s2592_s30 = smov 64  }
 0x2b4   : > { %2311 = dma.vmem_to_hbm [thread:$0]  (%p2653_p4), %s1982_s11, 2048, %s1984_s18, %s1966_s15, %s2592_s30, %s2592_s30, %s2584_s4  }
 0x2b5 PF: > { %p2317_p6 = scmp.ge.s32.totalorder %s2582_s17, 2  ;;  %s1998_s5 = sand.u32 1, %s2562_s12  }
 0x2b6   : > { %s1999_s6 = scalar_lea.sflag [#allocation3], %s1998_s5 }
 0x2b7   : > { %p2314_p7 = pnand %p2317_p6, %p2660_p8 }
 0x2b9   : > { %p2315_p9 = pneg %p2314_p7 }
 0x2bb   : > { %2557 = dma.done.wait (%p2315_p9), %s1999_s6, 2048  }
 0x2bc   : > { %2559 = vsyncadd (%p2315_p9), %s1999_s6, 4294965248  ;;  %s16_s17 = sadd.s32 1, %s2582_s17   ;;  %s3960_s12 = smov %s2566_s13 }
 0x2bd   : > { %p13_p10 = scmp.ge.s32.totalorder %s16_s17, 4   ;;  %s3961_s13 = smov %s2570_s14 }
 0x2be   : > { %s3962_s14 = smov %s2666_s25  ;;  %s3963_s15 = smov %s2578_s16 }
 0x2bf   : > { %s3964_s16 = smov %s3966_s20  ;;  %15 = sbr.rel (!%p13_p10) target bundleno = 4 (0x4), region = 68 }
 0x2c4   :  { %2005 = vsyncpa [#allocation3], 1 }
 0x2c5   :  { %2007 = vsyncpa [#allocation3 + $0x1], 1 }

</bundles_post_ra>
